<compile_context>
chip_gen: v7x
topology: tpu7x:2x2x1
jax: 0.10.0
libtpu: 0.0.40
codegen_flags: <defaults>
</compile_context>

<pallas_src>
import functools

import numpy as np
import jax
import jax.numpy as jnp
from jax import lax
from jax.experimental import pallas as pl
from jax.experimental.pallas import tpu as pltpu

EPS = 1e-5  # torch.nn.GroupNorm default eps


def _groupconv_kernel(w_ref, p_ref, m_ref, x_ref, o_ref, *,
                      C, Cb, K, dil, D, H, W):
    """One (n, channel-block) grid step.

    w_ref : SMEM (C*K^3,)      flattened depthwise conv taps [c][kd][kh][kw].
    p_ref : SMEM (4*C,)        [conv_bias | gn_weight | gn_bias | prelu_alpha].
    m_ref : VMEM (K*K, H*W)    lane boundary masks for the (kh,kw) flat shifts.
    x_ref : VMEM (Cb, D, H*W)  input block, (H,W) flattened onto lanes.
    o_ref : VMEM (Cb, D, H*W)  lane-dense output block.
    """
    HW = H * W
    K2 = K * K
    K3 = K * K2
    kc = (K - 1) // 2
    inv_n = 1.0 / float(D * HW)
    cg = pl.program_id(1)

    # Depth-boundary masks (one per off-center kd), built once per grid step.
    zidx = lax.broadcasted_iota(jnp.int32, (D, 1), 0)
    dmask = {}
    for kd in range(K):
        dz = (kd - kc) * dil
        if dz < 0:
            dmask[kd] = (zidx >= -dz).astype(jnp.float32)
        elif dz > 0:
            dmask[kd] = (zidx < D - dz).astype(jnp.float32)

    @pl.loop(0, Cb)
    def _per_channel(cb):
        c = cg * Cb + cb
        x_c = x_ref[cb].astype(jnp.float32)                       # (D, HW)

        # K independent per-kd partial accumulators (VALU ILP). Each (kh,kw)
        # lane-shifted operand is built once (roll + boundary mask) and reused
        # across all K depth taps (register-blocked MAC).
        parts = [jnp.zeros((D, HW), jnp.float32) for _ in range(K)]
        for kh in range(K):
            for kw in range(K):
                off = (kh - kc) * dil * W + (kw - kc) * dil
                shift = (-off) % HW
                xv = pltpu.roll(x_c, shift=shift, axis=1) if shift else x_c
                if not (kh == kc and kw == kc):
                    xv = xv * m_ref[pl.ds(kh * K + kw, 1), :]     # (1, HW) mask
                for kd in range(K):
                    tap = w_ref[c * K3 + kd * K2 + kh * K + kw]
                    parts[kd] = parts[kd] + xv * tap

        # Combine depth taps: out[z] = sum_kd P_kd[z + (kd-kc)*dil], zero outside.
        y = parts[kc]
        for kd in range(K):
            if kd == kc:
                continue
            dz = (kd - kc) * dil
            shifted = pltpu.roll(parts[kd], shift=(-dz) % D, axis=0)
            y = y + shifted * dmask[kd]
        y = y + p_ref[c]                                          # conv bias

        # GroupNorm (num_groups == C): two-pass per-channel stats.
        mean = jnp.sum(y) * inv_n
        yc = y - mean
        var = jnp.sum(yc * yc) * inv_n                            # biased, like torch
        scale = lax.rsqrt(var + EPS) * p_ref[C + c]
        out = yc * scale + p_ref[2 * C + c]

        # PReLU (alpha == 1.0 when act=False -> identity).
        alpha = p_ref[3 * C + c]
        out = jnp.where(out >= 0.0, out, alpha * out)
        o_ref[cb] = out.astype(o_ref.dtype)


def _pick_channel_block(N, C, per_channel_bytes, budget_bytes):
    """Largest divisor of C whose double-buffered in+out blocks fit the budget and
    that keeps the grid >= 2 steps (so v7x can shard 'parallel' axes across 2 TCs)."""
    best = 1
    for cand in range(1, C + 1):
        if C % cand:
            continue
        if 4 * cand * per_channel_bytes > budget_bytes:   # 2x in + 2x out buffers
            continue
        if cand > 1 and N * (C // cand) < 2:
            continue
        best = cand
    return best


def group_conv(x, conv_w, conv_b, gn_w, gn_b, alpha, *,
               kernel=3, stride=1, padding=1, dilation=1, act=True):
    """Pallas implementation of GroupConv.forward for NCDHW float32 input."""
    N, C, D, H, W = x.shape
    K = kernel
    assert stride == 1, "only stride=1 (module default) implemented"
    assert K % 2 == 1 and padding == dilation * (K - 1) // 2, \
        "same-size output (padding == dilation*(K-1)//2) required; holds for all DACB configs"
    HW = H * W
    kc = (K - 1) // 2

    x_flat = x.reshape(N, C, D, HW)                 # free (contiguous) reshape

    w_flat = conv_w.reshape(C * K * K * K).astype(jnp.float32)
    if act:
        alpha_v = jnp.broadcast_to(jnp.asarray(alpha, jnp.float32), (C,))
    else:
        alpha_v = jnp.ones((C,), jnp.float32)       # identity negative slope
    params = jnp.concatenate([conv_b.astype(jnp.float32), gn_w.astype(jnp.float32),
                              gn_b.astype(jnp.float32), alpha_v])            # (4*C,)

    # Lane boundary masks for the K*K flattened-(H,W) shifts (host-side constants).
    hh, ww = np.meshgrid(np.arange(H), np.arange(W), indexing="ij")
    masks = np.empty((K * K, HW), np.float32)
    for kh in range(K):
        for kw in range(K):
            dh = (kh - kc) * dilation
            dw = (kw - kc) * dilation
            valid = ((hh + dh >= 0) & (hh + dh < H) &
                     (ww + dw >= 0) & (ww + dw < W))
            masks[kh * K + kw] = valid.reshape(-1).astype(np.float32)
    masks = jnp.asarray(masks)

    itemsize = max(x.dtype.itemsize, 4)
    per_channel_bytes = D * HW * itemsize
    Cb = _pick_channel_block(N, C, per_channel_bytes, budget_bytes=8 << 20)
    grid = (N, C // Cb)

    # VMEM budget: double-buffered in/out blocks + mask table + headroom; cap at v7x 64 MiB.
    vmem_bytes = 4 * Cb * per_channel_bytes + 2 * K * K * HW * 4 + (4 << 20)
    vmem_bytes = int(min(vmem_bytes, 64 << 20))

    kernel_fn = functools.partial(_groupconv_kernel, C=C, Cb=Cb, K=K,
                                  dil=dilation, D=D, H=H, W=W)

    out = pl.pallas_call(
        kernel_fn,
        out_shape=jax.ShapeDtypeStruct((N, C, D, HW), x.dtype),
        grid=grid,
        in_specs=[
            pl.BlockSpec(memory_space=pltpu.SMEM),                         # conv taps
            pl.BlockSpec(memory_space=pltpu.SMEM),                         # per-channel scalars
            pl.BlockSpec((K * K, HW), lambda n, cg: (0, 0)),               # lane masks
            pl.BlockSpec((None, Cb, D, HW), lambda n, cg: (n, cg, 0, 0)),  # input block
        ],
        out_specs=pl.BlockSpec((None, Cb, D, HW), lambda n, cg: (n, cg, 0, 0)),
        compiler_params=pltpu.CompilerParams(
            dimension_semantics=("parallel", "parallel"),
            vmem_limit_bytes=vmem_bytes),
    )(w_flat, params, masks, x_flat)

    return out.reshape(N, C, D, H, W)


def _reference(x, conv_w, conv_b, gn_w, gn_b, alpha, *, padding, dilation):
    """Pure-JAX reference matching the PyTorch GroupConv forward."""
    C = x.shape[1]
    y = lax.conv_general_dilated(
        x, conv_w, window_strides=(1, 1, 1),
        padding=[(padding, padding)] * 3,
        rhs_dilation=(dilation, dilation, dilation),
        dimension_numbers=("NCDHW", "OIDHW", "NCDHW"),
        feature_group_count=C)
    y = y + conv_b[None, :, None, None, None]
    mean = y.mean(axis=(2, 3, 4), keepdims=True)
    var = ((y - mean) ** 2).mean(axis=(2, 3, 4), keepdims=True)
    y = (y - mean) / jnp.sqrt(var + EPS)
    y = y * gn_w[None, :, None, None, None] + gn_b[None, :, None, None, None]
    return jnp.where(y >= 0, y, alpha * y)


if __name__ == "__main__":
    # Small NCDHW volume; spatial sized so H*W = 256 is lane-dense (multiple of 128).
    N, C, D, H, W = 2, 8, 16, 16, 16
    K = 3

    key = jax.random.PRNGKey(0)
    kx, kw_, kb, kgw, kgb = jax.random.split(key, 5)

    x = jax.random.normal(kx, (N, C, D, H, W), jnp.float32)
    # Depthwise Conv3d(C, C, 3, groups=C): weight (C, 1, 3, 3, 3), bias (C,)
    conv_w = jax.random.normal(kw_, (C, 1, K, K, K), jnp.float32) * 0.2
    conv_b = jax.random.normal(kb, (C,), jnp.float32) * 0.1
    # GroupNorm(C, C) affine params
    gn_w = 1.0 + 0.1 * jax.random.normal(kgw, (C,), jnp.float32)
    gn_b = 0.1 * jax.random.normal(kgb, (C,), jnp.float32)
    # nn.PReLU() default: single shared parameter
    alpha = jnp.asarray(0.25, jnp.float32)

    # The three GroupConv configs used inside DACB: dilation 1 / 2 / 3 (padding = dilation).
    for dil in (1, 2, 3):
        out = group_conv(x, conv_w, conv_b, gn_w, gn_b, alpha,
                         kernel=K, stride=1, padding=dil, dilation=dil, act=True)
        out = jax.block_until_ready(out)
        ref = _reference(x, conv_w, conv_b, gn_w, gn_b, alpha, padding=dil, dilation=dil)
        assert out.shape == (N, C, D, H, W), out.shape
        err = float(jnp.max(jnp.abs(out - ref)))
        assert jnp.allclose(out, ref, atol=1e-4, rtol=1e-4), (dil, err)

    print("KERNEL_OK")
</pallas_src>

<mosaic_0001>
module attributes {stable_mosaic.version = 11 : i64} {
  func.func @_groupconv_kernel(%arg0: i32, %arg1: i32, %arg2: memref<216xf32, #tpu.memory_space<smem>>, %arg3: memref<32xf32, #tpu.memory_space<smem>>, %arg4: memref<9x256xf32, #tpu.memory_space<vmem>>, %arg5: memref<1x8x16x256xf32, #tpu.memory_space<vmem>>, %arg6: memref<1x8x16x256xf32, #tpu.memory_space<vmem>>) attributes {dimension_semantics = [#tpu.dimension_semantics<parallel>, #tpu.dimension_semantics<parallel>], iteration_bounds = array<i64: 2, 1>, scalar_prefetch = 0 : i64, scratch_operands = 0 : i64, tpu.core_type = #tpu.core_type<tc>, window_params = [{transform_indices = @transform_0, window_bounds = array<i64: 216>}, {transform_indices = @transform_1, window_bounds = array<i64: 32>}, {pipeline_mode = #tpu.pipeline_mode<synchronous>, transform_indices = @transform_2, window_bounds = array<i64: 9, 256>}, {transform_indices = @transform_3, window_bounds = array<i64: 1, 8, 16, 256>}, {transform_indices = @transform_4, window_bounds = array<i64: 1, 8, 16, 256>}]} {
    %0 = tpu.iota {dimensions = array<i32: 0>} : vector<16x1xi32>
    %c1_i32 = arith.constant 1 : i32
    %1 = vector.broadcast %c1_i32 : i32 to vector<16x1xi32>
    %2 = arith.cmpi sge, %0, %1 : vector<16x1xi32>
    %3 = arith.extui %2 : vector<16x1xi1> to vector<16x1xi32>
    %4 = arith.sitofp %3 : vector<16x1xi32> to vector<16x1xf32>
    %c15_i32 = arith.constant 15 : i32
    %5 = vector.broadcast %c15_i32 : i32 to vector<16x1xi32>
    %6 = arith.cmpi slt, %0, %5 : vector<16x1xi32>
    %7 = arith.extui %6 : vector<16x1xi1> to vector<16x1xi32>
    %8 = arith.sitofp %7 : vector<16x1xi32> to vector<16x1xf32>
    %c0_i32 = arith.constant 0 : i32
    %c8_i32 = arith.constant 8 : i32
    %9 = arith.addi %c0_i32, %c8_i32 : i32
    %c1_i32_0 = arith.constant 1 : i32
    scf.for %arg7 = %c0_i32 to %9 step %c1_i32_0  : i32 {
      %c1_i32_2 = arith.constant 1 : i32
      %10 = arith.muli %arg7, %c1_i32_2 : i32
      %c0_i32_3 = arith.constant 0 : i32
      %11 = arith.addi %c0_i32_3, %10 : i32
      %c8_i32_4 = arith.constant 8 : i32
      %12 = arith.muli %arg1, %c8_i32_4 : i32
      %13 = arith.addi %12, %11 : i32
      %c0 = arith.constant 0 : index
      %14 = arith.index_cast %11 : i32 to index
      %c0_5 = arith.constant 0 : index
      %c0_6 = arith.constant 0 : index
      %15 = vector.load %arg5[%c0, %14, %c0_5, %c0_6] : memref<1x8x16x256xf32, #tpu.memory_space<vmem>>, vector<1x1x16x256xf32>
      %16 = vector.shape_cast %15 : vector<1x1x16x256xf32> to vector<16x256xf32>
      %cst = arith.constant 0.000000e+00 : f32
      %17 = vector.broadcast %cst : f32 to vector<16x256xf32>
      %cst_7 = arith.constant 0.000000e+00 : f32
      %18 = vector.broadcast %cst_7 : f32 to vector<16x256xf32>
      %cst_8 = arith.constant 0.000000e+00 : f32
      %19 = vector.broadcast %cst_8 : f32 to vector<16x256xf32>
      %c17_i32 = arith.constant 17 : i32
      %20 = tpu.dynamic_rotate %16 by %c17_i32 dim 1 : vector<16x256xf32>, i32 -> vector<16x256xf32>
      %c0_9 = arith.constant 0 : index
      %c0_10 = arith.constant 0 : index
      %21 = vector.load %arg4[%c0_9, %c0_10] : memref<9x256xf32, #tpu.memory_space<vmem>>, vector<1x256xf32>
      %22 = vector.broadcast %21 : vector<1x256xf32> to vector<16x256xf32>
      %23 = arith.mulf %20, %22 : vector<16x256xf32>
      %c27_i32 = arith.constant 27 : i32
      %24 = arith.muli %13, %c27_i32 : i32
      %c0_i32_11 = arith.constant 0 : i32
      %25 = arith.addi %24, %c0_i32_11 : i32
      %c0_i32_12 = arith.constant 0 : i32
      %26 = arith.addi %25, %c0_i32_12 : i32
      %c0_i32_13 = arith.constant 0 : i32
      %27 = arith.addi %26, %c0_i32_13 : i32
      %28 = arith.index_cast %27 : i32 to index
      %29 = memref.load %arg2[%28] : memref<216xf32, #tpu.memory_space<smem>>
      %30 = vector.broadcast %29 : f32 to vector<16x256xf32>
      %31 = arith.mulf %23, %30 : vector<16x256xf32>
      %32 = arith.addf %17, %31 : vector<16x256xf32>
      %c27_i32_14 = arith.constant 27 : i32
      %33 = arith.muli %13, %c27_i32_14 : i32
      %c9_i32 = arith.constant 9 : i32
      %34 = arith.addi %33, %c9_i32 : i32
      %c0_i32_15 = arith.constant 0 : i32
      %35 = arith.addi %34, %c0_i32_15 : i32
      %c0_i32_16 = arith.constant 0 : i32
      %36 = arith.addi %35, %c0_i32_16 : i32
      %37 = arith.index_cast %36 : i32 to index
      %38 = memref.load %arg2[%37] : memref<216xf32, #tpu.memory_space<smem>>
      %39 = vector.broadcast %38 : f32 to vector<16x256xf32>
      %40 = arith.mulf %23, %39 : vector<16x256xf32>
      %41 = arith.addf %18, %40 : vector<16x256xf32>
      %c27_i32_17 = arith.constant 27 : i32
      %42 = arith.muli %13, %c27_i32_17 : i32
      %c18_i32 = arith.constant 18 : i32
      %43 = arith.addi %42, %c18_i32 : i32
      %c0_i32_18 = arith.constant 0 : i32
      %44 = arith.addi %43, %c0_i32_18 : i32
      %c0_i32_19 = arith.constant 0 : i32
      %45 = arith.addi %44, %c0_i32_19 : i32
      %46 = arith.index_cast %45 : i32 to index
      %47 = memref.load %arg2[%46] : memref<216xf32, #tpu.memory_space<smem>>
      %48 = vector.broadcast %47 : f32 to vector<16x256xf32>
      %49 = arith.mulf %23, %48 : vector<16x256xf32>
      %50 = arith.addf %19, %49 : vector<16x256xf32>
      %c16_i32 = arith.constant 16 : i32
      %51 = tpu.dynamic_rotate %16 by %c16_i32 dim 1 : vector<16x256xf32>, i32 -> vector<16x256xf32>
      %c1 = arith.constant 1 : index
      %c0_20 = arith.constant 0 : index
      %52 = vector.load %arg4[%c1, %c0_20] : memref<9x256xf32, #tpu.memory_space<vmem>>, vector<1x256xf32>
      %53 = vector.broadcast %52 : vector<1x256xf32> to vector<16x256xf32>
      %54 = arith.mulf %51, %53 : vector<16x256xf32>
      %c27_i32_21 = arith.constant 27 : i32
      %55 = arith.muli %13, %c27_i32_21 : i32
      %c0_i32_22 = arith.constant 0 : i32
      %56 = arith.addi %55, %c0_i32_22 : i32
      %c0_i32_23 = arith.constant 0 : i32
      %57 = arith.addi %56, %c0_i32_23 : i32
      %c1_i32_24 = arith.constant 1 : i32
      %58 = arith.addi %57, %c1_i32_24 : i32
      %59 = arith.index_cast %58 : i32 to index
      %60 = memref.load %arg2[%59] : memref<216xf32, #tpu.memory_space<smem>>
      %61 = vector.broadcast %60 : f32 to vector<16x256xf32>
      %62 = arith.mulf %54, %61 : vector<16x256xf32>
      %63 = arith.addf %32, %62 : vector<16x256xf32>
      %c27_i32_25 = arith.constant 27 : i32
      %64 = arith.muli %13, %c27_i32_25 : i32
      %c9_i32_26 = arith.constant 9 : i32
      %65 = arith.addi %64, %c9_i32_26 : i32
      %c0_i32_27 = arith.constant 0 : i32
      %66 = arith.addi %65, %c0_i32_27 : i32
      %c1_i32_28 = arith.constant 1 : i32
      %67 = arith.addi %66, %c1_i32_28 : i32
      %68 = arith.index_cast %67 : i32 to index
      %69 = memref.load %arg2[%68] : memref<216xf32, #tpu.memory_space<smem>>
      %70 = vector.broadcast %69 : f32 to vector<16x256xf32>
      %71 = arith.mulf %54, %70 : vector<16x256xf32>
      %72 = arith.addf %41, %71 : vector<16x256xf32>
      %c27_i32_29 = arith.constant 27 : i32
      %73 = arith.muli %13, %c27_i32_29 : i32
      %c18_i32_30 = arith.constant 18 : i32
      %74 = arith.addi %73, %c18_i32_30 : i32
      %c0_i32_31 = arith.constant 0 : i32
      %75 = arith.addi %74, %c0_i32_31 : i32
      %c1_i32_32 = arith.constant 1 : i32
      %76 = arith.addi %75, %c1_i32_32 : i32
      %77 = arith.index_cast %76 : i32 to index
      %78 = memref.load %arg2[%77] : memref<216xf32, #tpu.memory_space<smem>>
      %79 = vector.broadcast %78 : f32 to vector<16x256xf32>
      %80 = arith.mulf %54, %79 : vector<16x256xf32>
      %81 = arith.addf %50, %80 : vector<16x256xf32>
      %c15_i32_33 = arith.constant 15 : i32
      %82 = tpu.dynamic_rotate %16 by %c15_i32_33 dim 1 : vector<16x256xf32>, i32 -> vector<16x256xf32>
      %c2 = arith.constant 2 : index
      %c0_34 = arith.constant 0 : index
      %83 = vector.load %arg4[%c2, %c0_34] : memref<9x256xf32, #tpu.memory_space<vmem>>, vector<1x256xf32>
      %84 = vector.broadcast %83 : vector<1x256xf32> to vector<16x256xf32>
      %85 = arith.mulf %82, %84 : vector<16x256xf32>
      %c27_i32_35 = arith.constant 27 : i32
      %86 = arith.muli %13, %c27_i32_35 : i32
      %c0_i32_36 = arith.constant 0 : i32
      %87 = arith.addi %86, %c0_i32_36 : i32
      %c0_i32_37 = arith.constant 0 : i32
      %88 = arith.addi %87, %c0_i32_37 : i32
      %c2_i32 = arith.constant 2 : i32
      %89 = arith.addi %88, %c2_i32 : i32
      %90 = arith.index_cast %89 : i32 to index
      %91 = memref.load %arg2[%90] : memref<216xf32, #tpu.memory_space<smem>>
      %92 = vector.broadcast %91 : f32 to vector<16x256xf32>
      %93 = arith.mulf %85, %92 : vector<16x256xf32>
      %94 = arith.addf %63, %93 : vector<16x256xf32>
      %c27_i32_38 = arith.constant 27 : i32
      %95 = arith.muli %13, %c27_i32_38 : i32
      %c9_i32_39 = arith.constant 9 : i32
      %96 = arith.addi %95, %c9_i32_39 : i32
      %c0_i32_40 = arith.constant 0 : i32
      %97 = arith.addi %96, %c0_i32_40 : i32
      %c2_i32_41 = arith.constant 2 : i32
      %98 = arith.addi %97, %c2_i32_41 : i32
      %99 = arith.index_cast %98 : i32 to index
      %100 = memref.load %arg2[%99] : memref<216xf32, #tpu.memory_space<smem>>
      %101 = vector.broadcast %100 : f32 to vector<16x256xf32>
      %102 = arith.mulf %85, %101 : vector<16x256xf32>
      %103 = arith.addf %72, %102 : vector<16x256xf32>
      %c27_i32_42 = arith.constant 27 : i32
      %104 = arith.muli %13, %c27_i32_42 : i32
      %c18_i32_43 = arith.constant 18 : i32
      %105 = arith.addi %104, %c18_i32_43 : i32
      %c0_i32_44 = arith.constant 0 : i32
      %106 = arith.addi %105, %c0_i32_44 : i32
      %c2_i32_45 = arith.constant 2 : i32
      %107 = arith.addi %106, %c2_i32_45 : i32
      %108 = arith.index_cast %107 : i32 to index
      %109 = memref.load %arg2[%108] : memref<216xf32, #tpu.memory_space<smem>>
      %110 = vector.broadcast %109 : f32 to vector<16x256xf32>
      %111 = arith.mulf %85, %110 : vector<16x256xf32>
      %112 = arith.addf %81, %111 : vector<16x256xf32>
      %c1_i32_46 = arith.constant 1 : i32
      %113 = tpu.dynamic_rotate %16 by %c1_i32_46 dim 1 : vector<16x256xf32>, i32 -> vector<16x256xf32>
      %c3 = arith.constant 3 : index
      %c0_47 = arith.constant 0 : index
      %114 = vector.load %arg4[%c3, %c0_47] : memref<9x256xf32, #tpu.memory_space<vmem>>, vector<1x256xf32>
      %115 = vector.broadcast %114 : vector<1x256xf32> to vector<16x256xf32>
      %116 = arith.mulf %113, %115 : vector<16x256xf32>
      %c27_i32_48 = arith.constant 27 : i32
      %117 = arith.muli %13, %c27_i32_48 : i32
      %c0_i32_49 = arith.constant 0 : i32
      %118 = arith.addi %117, %c0_i32_49 : i32
      %c3_i32 = arith.constant 3 : i32
      %119 = arith.addi %118, %c3_i32 : i32
      %c0_i32_50 = arith.constant 0 : i32
      %120 = arith.addi %119, %c0_i32_50 : i32
      %121 = arith.index_cast %120 : i32 to index
      %122 = memref.load %arg2[%121] : memref<216xf32, #tpu.memory_space<smem>>
      %123 = vector.broadcast %122 : f32 to vector<16x256xf32>
      %124 = arith.mulf %116, %123 : vector<16x256xf32>
      %125 = arith.addf %94, %124 : vector<16x256xf32>
      %c27_i32_51 = arith.constant 27 : i32
      %126 = arith.muli %13, %c27_i32_51 : i32
      %c9_i32_52 = arith.constant 9 : i32
      %127 = arith.addi %126, %c9_i32_52 : i32
      %c3_i32_53 = arith.constant 3 : i32
      %128 = arith.addi %127, %c3_i32_53 : i32
      %c0_i32_54 = arith.constant 0 : i32
      %129 = arith.addi %128, %c0_i32_54 : i32
      %130 = arith.index_cast %129 : i32 to index
      %131 = memref.load %arg2[%130] : memref<216xf32, #tpu.memory_space<smem>>
      %132 = vector.broadcast %131 : f32 to vector<16x256xf32>
      %133 = arith.mulf %116, %132 : vector<16x256xf32>
      %134 = arith.addf %103, %133 : vector<16x256xf32>
      %c27_i32_55 = arith.constant 27 : i32
      %135 = arith.muli %13, %c27_i32_55 : i32
      %c18_i32_56 = arith.constant 18 : i32
      %136 = arith.addi %135, %c18_i32_56 : i32
      %c3_i32_57 = arith.constant 3 : i32
      %137 = arith.addi %136, %c3_i32_57 : i32
      %c0_i32_58 = arith.constant 0 : i32
      %138 = arith.addi %137, %c0_i32_58 : i32
      %139 = arith.index_cast %138 : i32 to index
      %140 = memref.load %arg2[%139] : memref<216xf32, #tpu.memory_space<smem>>
      %141 = vector.broadcast %140 : f32 to vector<16x256xf32>
      %142 = arith.mulf %116, %141 : vector<16x256xf32>
      %143 = arith.addf %112, %142 : vector<16x256xf32>
      %c27_i32_59 = arith.constant 27 : i32
      %144 = arith.muli %13, %c27_i32_59 : i32
      %c0_i32_60 = arith.constant 0 : i32
      %145 = arith.addi %144, %c0_i32_60 : i32
      %c3_i32_61 = arith.constant 3 : i32
      %146 = arith.addi %145, %c3_i32_61 : i32
      %c1_i32_62 = arith.constant 1 : i32
      %147 = arith.addi %146, %c1_i32_62 : i32
      %148 = arith.index_cast %147 : i32 to index
      %149 = memref.load %arg2[%148] : memref<216xf32, #tpu.memory_space<smem>>
      %150 = vector.broadcast %149 : f32 to vector<16x256xf32>
      %151 = arith.mulf %16, %150 : vector<16x256xf32>
      %152 = arith.addf %125, %151 : vector<16x256xf32>
      %c27_i32_63 = arith.constant 27 : i32
      %153 = arith.muli %13, %c27_i32_63 : i32
      %c9_i32_64 = arith.constant 9 : i32
      %154 = arith.addi %153, %c9_i32_64 : i32
      %c3_i32_65 = arith.constant 3 : i32
      %155 = arith.addi %154, %c3_i32_65 : i32
      %c1_i32_66 = arith.constant 1 : i32
      %156 = arith.addi %155, %c1_i32_66 : i32
      %157 = arith.index_cast %156 : i32 to index
      %158 = memref.load %arg2[%157] : memref<216xf32, #tpu.memory_space<smem>>
      %159 = vector.broadcast %158 : f32 to vector<16x256xf32>
      %160 = arith.mulf %16, %159 : vector<16x256xf32>
      %161 = arith.addf %134, %160 : vector<16x256xf32>
      %c27_i32_67 = arith.constant 27 : i32
      %162 = arith.muli %13, %c27_i32_67 : i32
      %c18_i32_68 = arith.constant 18 : i32
      %163 = arith.addi %162, %c18_i32_68 : i32
      %c3_i32_69 = arith.constant 3 : i32
      %164 = arith.addi %163, %c3_i32_69 : i32
      %c1_i32_70 = arith.constant 1 : i32
      %165 = arith.addi %164, %c1_i32_70 : i32
      %166 = arith.index_cast %165 : i32 to index
      %167 = memref.load %arg2[%166] : memref<216xf32, #tpu.memory_space<smem>>
      %168 = vector.broadcast %167 : f32 to vector<16x256xf32>
      %169 = arith.mulf %16, %168 : vector<16x256xf32>
      %170 = arith.addf %143, %169 : vector<16x256xf32>
      %c255_i32 = arith.constant 255 : i32
      %171 = tpu.dynamic_rotate %16 by %c255_i32 dim 1 : vector<16x256xf32>, i32 -> vector<16x256xf32>
      %c5 = arith.constant 5 : index
      %c0_71 = arith.constant 0 : index
      %172 = vector.load %arg4[%c5, %c0_71] : memref<9x256xf32, #tpu.memory_space<vmem>>, vector<1x256xf32>
      %173 = vector.broadcast %172 : vector<1x256xf32> to vector<16x256xf32>
      %174 = arith.mulf %171, %173 : vector<16x256xf32>
      %c27_i32_72 = arith.constant 27 : i32
      %175 = arith.muli %13, %c27_i32_72 : i32
      %c0_i32_73 = arith.constant 0 : i32
      %176 = arith.addi %175, %c0_i32_73 : i32
      %c3_i32_74 = arith.constant 3 : i32
      %177 = arith.addi %176, %c3_i32_74 : i32
      %c2_i32_75 = arith.constant 2 : i32
      %178 = arith.addi %177, %c2_i32_75 : i32
      %179 = arith.index_cast %178 : i32 to index
      %180 = memref.load %arg2[%179] : memref<216xf32, #tpu.memory_space<smem>>
      %181 = vector.broadcast %180 : f32 to vector<16x256xf32>
      %182 = arith.mulf %174, %181 : vector<16x256xf32>
      %183 = arith.addf %152, %182 : vector<16x256xf32>
      %c27_i32_76 = arith.constant 27 : i32
      %184 = arith.muli %13, %c27_i32_76 : i32
      %c9_i32_77 = arith.constant 9 : i32
      %185 = arith.addi %184, %c9_i32_77 : i32
      %c3_i32_78 = arith.constant 3 : i32
      %186 = arith.addi %185, %c3_i32_78 : i32
      %c2_i32_79 = arith.constant 2 : i32
      %187 = arith.addi %186, %c2_i32_79 : i32
      %188 = arith.index_cast %187 : i32 to index
      %189 = memref.load %arg2[%188] : memref<216xf32, #tpu.memory_space<smem>>
      %190 = vector.broadcast %189 : f32 to vector<16x256xf32>
      %191 = arith.mulf %174, %190 : vector<16x256xf32>
      %192 = arith.addf %161, %191 : vector<16x256xf32>
      %c27_i32_80 = arith.constant 27 : i32
      %193 = arith.muli %13, %c27_i32_80 : i32
      %c18_i32_81 = arith.constant 18 : i32
      %194 = arith.addi %193, %c18_i32_81 : i32
      %c3_i32_82 = arith.constant 3 : i32
      %195 = arith.addi %194, %c3_i32_82 : i32
      %c2_i32_83 = arith.constant 2 : i32
      %196 = arith.addi %195, %c2_i32_83 : i32
      %197 = arith.index_cast %196 : i32 to index
      %198 = memref.load %arg2[%197] : memref<216xf32, #tpu.memory_space<smem>>
      %199 = vector.broadcast %198 : f32 to vector<16x256xf32>
      %200 = arith.mulf %174, %199 : vector<16x256xf32>
      %201 = arith.addf %170, %200 : vector<16x256xf32>
      %c241_i32 = arith.constant 241 : i32
      %202 = tpu.dynamic_rotate %16 by %c241_i32 dim 1 : vector<16x256xf32>, i32 -> vector<16x256xf32>
      %c6 = arith.constant 6 : index
      %c0_84 = arith.constant 0 : index
      %203 = vector.load %arg4[%c6, %c0_84] : memref<9x256xf32, #tpu.memory_space<vmem>>, vector<1x256xf32>
      %204 = vector.broadcast %203 : vector<1x256xf32> to vector<16x256xf32>
      %205 = arith.mulf %202, %204 : vector<16x256xf32>
      %c27_i32_85 = arith.constant 27 : i32
      %206 = arith.muli %13, %c27_i32_85 : i32
      %c0_i32_86 = arith.constant 0 : i32
      %207 = arith.addi %206, %c0_i32_86 : i32
      %c6_i32 = arith.constant 6 : i32
      %208 = arith.addi %207, %c6_i32 : i32
      %c0_i32_87 = arith.constant 0 : i32
      %209 = arith.addi %208, %c0_i32_87 : i32
      %210 = arith.index_cast %209 : i32 to index
      %211 = memref.load %arg2[%210] : memref<216xf32, #tpu.memory_space<smem>>
      %212 = vector.broadcast %211 : f32 to vector<16x256xf32>
      %213 = arith.mulf %205, %212 : vector<16x256xf32>
      %214 = arith.addf %183, %213 : vector<16x256xf32>
      %c27_i32_88 = arith.constant 27 : i32
      %215 = arith.muli %13, %c27_i32_88 : i32
      %c9_i32_89 = arith.constant 9 : i32
      %216 = arith.addi %215, %c9_i32_89 : i32
      %c6_i32_90 = arith.constant 6 : i32
      %217 = arith.addi %216, %c6_i32_90 : i32
      %c0_i32_91 = arith.constant 0 : i32
      %218 = arith.addi %217, %c0_i32_91 : i32
      %219 = arith.index_cast %218 : i32 to index
      %220 = memref.load %arg2[%219] : memref<216xf32, #tpu.memory_space<smem>>
      %221 = vector.broadcast %220 : f32 to vector<16x256xf32>
      %222 = arith.mulf %205, %221 : vector<16x256xf32>
      %223 = arith.addf %192, %222 : vector<16x256xf32>
      %c27_i32_92 = arith.constant 27 : i32
      %224 = arith.muli %13, %c27_i32_92 : i32
      %c18_i32_93 = arith.constant 18 : i32
      %225 = arith.addi %224, %c18_i32_93 : i32
      %c6_i32_94 = arith.constant 6 : i32
      %226 = arith.addi %225, %c6_i32_94 : i32
      %c0_i32_95 = arith.constant 0 : i32
      %227 = arith.addi %226, %c0_i32_95 : i32
      %228 = arith.index_cast %227 : i32 to index
      %229 = memref.load %arg2[%228] : memref<216xf32, #tpu.memory_space<smem>>
      %230 = vector.broadcast %229 : f32 to vector<16x256xf32>
      %231 = arith.mulf %205, %230 : vector<16x256xf32>
      %232 = arith.addf %201, %231 : vector<16x256xf32>
      %c240_i32 = arith.constant 240 : i32
      %233 = tpu.dynamic_rotate %16 by %c240_i32 dim 1 : vector<16x256xf32>, i32 -> vector<16x256xf32>
      %c7 = arith.constant 7 : index
      %c0_96 = arith.constant 0 : index
      %234 = vector.load %arg4[%c7, %c0_96] : memref<9x256xf32, #tpu.memory_space<vmem>>, vector<1x256xf32>
      %235 = vector.broadcast %234 : vector<1x256xf32> to vector<16x256xf32>
      %236 = arith.mulf %233, %235 : vector<16x256xf32>
      %c27_i32_97 = arith.constant 27 : i32
      %237 = arith.muli %13, %c27_i32_97 : i32
      %c0_i32_98 = arith.constant 0 : i32
      %238 = arith.addi %237, %c0_i32_98 : i32
      %c6_i32_99 = arith.constant 6 : i32
      %239 = arith.addi %238, %c6_i32_99 : i32
      %c1_i32_100 = arith.constant 1 : i32
      %240 = arith.addi %239, %c1_i32_100 : i32
      %241 = arith.index_cast %240 : i32 to index
      %242 = memref.load %arg2[%241] : memref<216xf32, #tpu.memory_space<smem>>
      %243 = vector.broadcast %242 : f32 to vector<16x256xf32>
      %244 = arith.mulf %236, %243 : vector<16x256xf32>
      %245 = arith.addf %214, %244 : vector<16x256xf32>
      %c27_i32_101 = arith.constant 27 : i32
      %246 = arith.muli %13, %c27_i32_101 : i32
      %c9_i32_102 = arith.constant 9 : i32
      %247 = arith.addi %246, %c9_i32_102 : i32
      %c6_i32_103 = arith.constant 6 : i32
      %248 = arith.addi %247, %c6_i32_103 : i32
      %c1_i32_104 = arith.constant 1 : i32
      %249 = arith.addi %248, %c1_i32_104 : i32
      %250 = arith.index_cast %249 : i32 to index
      %251 = memref.load %arg2[%250] : memref<216xf32, #tpu.memory_space<smem>>
      %252 = vector.broadcast %251 : f32 to vector<16x256xf32>
      %253 = arith.mulf %236, %252 : vector<16x256xf32>
      %254 = arith.addf %223, %253 : vector<16x256xf32>
      %c27_i32_105 = arith.constant 27 : i32
      %255 = arith.muli %13, %c27_i32_105 : i32
      %c18_i32_106 = arith.constant 18 : i32
      %256 = arith.addi %255, %c18_i32_106 : i32
      %c6_i32_107 = arith.constant 6 : i32
      %257 = arith.addi %256, %c6_i32_107 : i32
      %c1_i32_108 = arith.constant 1 : i32
      %258 = arith.addi %257, %c1_i32_108 : i32
      %259 = arith.index_cast %258 : i32 to index
      %260 = memref.load %arg2[%259] : memref<216xf32, #tpu.memory_space<smem>>
      %261 = vector.broadcast %260 : f32 to vector<16x256xf32>
      %262 = arith.mulf %236, %261 : vector<16x256xf32>
      %263 = arith.addf %232, %262 : vector<16x256xf32>
      %c239_i32 = arith.constant 239 : i32
      %264 = tpu.dynamic_rotate %16 by %c239_i32 dim 1 : vector<16x256xf32>, i32 -> vector<16x256xf32>
      %c8 = arith.constant 8 : index
      %c0_109 = arith.constant 0 : index
      %265 = vector.load %arg4[%c8, %c0_109] : memref<9x256xf32, #tpu.memory_space<vmem>>, vector<1x256xf32>
      %266 = vector.broadcast %265 : vector<1x256xf32> to vector<16x256xf32>
      %267 = arith.mulf %264, %266 : vector<16x256xf32>
      %c27_i32_110 = arith.constant 27 : i32
      %268 = arith.muli %13, %c27_i32_110 : i32
      %c0_i32_111 = arith.constant 0 : i32
      %269 = arith.addi %268, %c0_i32_111 : i32
      %c6_i32_112 = arith.constant 6 : i32
      %270 = arith.addi %269, %c6_i32_112 : i32
      %c2_i32_113 = arith.constant 2 : i32
      %271 = arith.addi %270, %c2_i32_113 : i32
      %272 = arith.index_cast %271 : i32 to index
      %273 = memref.load %arg2[%272] : memref<216xf32, #tpu.memory_space<smem>>
      %274 = vector.broadcast %273 : f32 to vector<16x256xf32>
      %275 = arith.mulf %267, %274 : vector<16x256xf32>
      %276 = arith.addf %245, %275 : vector<16x256xf32>
      %c27_i32_114 = arith.constant 27 : i32
      %277 = arith.muli %13, %c27_i32_114 : i32
      %c9_i32_115 = arith.constant 9 : i32
      %278 = arith.addi %277, %c9_i32_115 : i32
      %c6_i32_116 = arith.constant 6 : i32
      %279 = arith.addi %278, %c6_i32_116 : i32
      %c2_i32_117 = arith.constant 2 : i32
      %280 = arith.addi %279, %c2_i32_117 : i32
      %281 = arith.index_cast %280 : i32 to index
      %282 = memref.load %arg2[%281] : memref<216xf32, #tpu.memory_space<smem>>
      %283 = vector.broadcast %282 : f32 to vector<16x256xf32>
      %284 = arith.mulf %267, %283 : vector<16x256xf32>
      %285 = arith.addf %254, %284 : vector<16x256xf32>
      %c27_i32_118 = arith.constant 27 : i32
      %286 = arith.muli %13, %c27_i32_118 : i32
      %c18_i32_119 = arith.constant 18 : i32
      %287 = arith.addi %286, %c18_i32_119 : i32
      %c6_i32_120 = arith.constant 6 : i32
      %288 = arith.addi %287, %c6_i32_120 : i32
      %c2_i32_121 = arith.constant 2 : i32
      %289 = arith.addi %288, %c2_i32_121 : i32
      %290 = arith.index_cast %289 : i32 to index
      %291 = memref.load %arg2[%290] : memref<216xf32, #tpu.memory_space<smem>>
      %292 = vector.broadcast %291 : f32 to vector<16x256xf32>
      %293 = arith.mulf %267, %292 : vector<16x256xf32>
      %294 = arith.addf %263, %293 : vector<16x256xf32>
      %c1_i32_122 = arith.constant 1 : i32
      %295 = tpu.dynamic_rotate %276 by %c1_i32_122 dim 0 : vector<16x256xf32>, i32 -> vector<16x256xf32>
      %296 = vector.broadcast %4 : vector<16x1xf32> to vector<16x256xf32>
      %297 = arith.mulf %295, %296 : vector<16x256xf32>
      %298 = arith.addf %285, %297 : vector<16x256xf32>
      %c15_i32_123 = arith.constant 15 : i32
      %299 = tpu.dynamic_rotate %294 by %c15_i32_123 dim 0 : vector<16x256xf32>, i32 -> vector<16x256xf32>
      %300 = vector.broadcast %8 : vector<16x1xf32> to vector<16x256xf32>
      %301 = arith.mulf %299, %300 : vector<16x256xf32>
      %302 = arith.addf %298, %301 : vector<16x256xf32>
      %303 = arith.index_cast %13 : i32 to index
      %304 = memref.load %arg3[%303] : memref<32xf32, #tpu.memory_space<smem>>
      %305 = vector.broadcast %304 : f32 to vector<16x256xf32>
      %306 = arith.addf %302, %305 : vector<16x256xf32>
      %307 = vector.shape_cast %306 : vector<16x256xf32> to vector<1x16x256xf32>
      %cst_124 = arith.constant dense<0.000000e+00> : vector<1xf32>
      %308 = vector.multi_reduction <add>, %307, %cst_124 [1, 2] : vector<1x16x256xf32> to vector<1xf32>
      %309 = vector.shape_cast %308 : vector<1xf32> to vector<1x1x1xf32>
      %310 = vector.extract %309[0, 0, 0] : f32 from vector<1x1x1xf32>
      %cst_125 = arith.constant 2.44140625E-4 : f32
      %311 = arith.mulf %310, %cst_125 : f32
      %312 = vector.broadcast %311 : f32 to vector<16x256xf32>
      %313 = arith.subf %306, %312 : vector<16x256xf32>
      %314 = arith.mulf %313, %313 : vector<16x256xf32>
      %315 = vector.shape_cast %314 : vector<16x256xf32> to vector<1x16x256xf32>
      %cst_126 = arith.constant dense<0.000000e+00> : vector<1xf32>
      %316 = vector.multi_reduction <add>, %315, %cst_126 [1, 2] : vector<1x16x256xf32> to vector<1xf32>
      %317 = vector.shape_cast %316 : vector<1xf32> to vector<1x1x1xf32>
      %318 = vector.extract %317[0, 0, 0] : f32 from vector<1x1x1xf32>
      %cst_127 = arith.constant 2.44140625E-4 : f32
      %319 = arith.mulf %318, %cst_127 : f32
      %cst_128 = arith.constant 9.99999974E-6 : f32
      %320 = arith.addf %319, %cst_128 : f32
      %321 = math.rsqrt %320 : f32
      %c8_i32_129 = arith.constant 8 : i32
      %322 = arith.addi %c8_i32_129, %13 : i32
      %323 = arith.index_cast %322 : i32 to index
      %324 = memref.load %arg3[%323] : memref<32xf32, #tpu.memory_space<smem>>
      %325 = arith.mulf %321, %324 : f32
      %326 = vector.broadcast %325 : f32 to vector<16x256xf32>
      %327 = arith.mulf %313, %326 : vector<16x256xf32>
      %c16_i32_130 = arith.constant 16 : i32
      %328 = arith.addi %c16_i32_130, %13 : i32
      %329 = arith.index_cast %328 : i32 to index
      %330 = memref.load %arg3[%329] : memref<32xf32, #tpu.memory_space<smem>>
      %331 = vector.broadcast %330 : f32 to vector<16x256xf32>
      %332 = arith.addf %327, %331 : vector<16x256xf32>
      %c24_i32 = arith.constant 24 : i32
      %333 = arith.addi %c24_i32, %13 : i32
      %334 = arith.index_cast %333 : i32 to index
      %335 = memref.load %arg3[%334] : memref<32xf32, #tpu.memory_space<smem>>
      %cst_131 = arith.constant 0.000000e+00 : f32
      %336 = vector.broadcast %cst_131 : f32 to vector<16x256xf32>
      %337 = arith.cmpf oge, %332, %336 : vector<16x256xf32>
      %338 = vector.broadcast %335 : f32 to vector<16x256xf32>
      %339 = arith.mulf %338, %332 : vector<16x256xf32>
      %340 = arith.select %337, %332, %339 : vector<16x256xi1>, vector<16x256xf32>
      %c0_132 = arith.constant 0 : index
      %341 = arith.index_cast %11 : i32 to index
      %c0_133 = arith.constant 0 : index
      %c0_134 = arith.constant 0 : index
      %342 = vector.load %arg6[%c0_132, %341, %c0_133, %c0_134] : memref<1x8x16x256xf32, #tpu.memory_space<vmem>>, vector<1x1x16x256xf32>
      %343 = vector.shape_cast %342 : vector<1x1x16x256xf32> to vector<16x256xf32>
      %344 = vector.shape_cast %340 : vector<16x256xf32> to vector<1x1x16x256xf32>
      tpu.vector_store %arg6[%c0_132, %341, %c0_133, %c0_134], %344 {strides = array<i32>} : memref<1x8x16x256xf32, #tpu.memory_space<vmem>>, vector<1x1x16x256xf32>,
    }
    %c8_i32_1 = arith.constant 8 : i32
    return
  }
  func.func @transform_0(%arg0: i32, %arg1: i32) -> i32 {
    %c0_i32 = arith.constant 0 : i32
    %c0_i32_0 = arith.constant 0 : i32
    return %c0_i32 : i32
  }
  func.func @transform_1(%arg0: i32, %arg1: i32) -> i32 {
    %c0_i32 = arith.constant 0 : i32
    %c0_i32_0 = arith.constant 0 : i32
    return %c0_i32 : i32
  }
  func.func @transform_2(%arg0: i32, %arg1: i32) -> (i32, i32) {
    %c0_i32 = arith.constant 0 : i32
    %c0_i32_0 = arith.constant 0 : i32
    %c0_i32_1 = arith.constant 0 : i32
    return %c0_i32, %c0_i32_0 : i32, i32
  }
  func.func @transform_3(%arg0: i32, %arg1: i32) -> (i32, i32, i32, i32) {
    %c0_i32 = arith.constant 0 : i32
    %c0_i32_0 = arith.constant 0 : i32
    %c0_i32_1 = arith.constant 0 : i32
    return %arg0, %arg1, %c0_i32, %c0_i32_0 : i32, i32, i32, i32
  }
  func.func @transform_4(%arg0: i32, %arg1: i32) -> (i32, i32, i32, i32) {
    %c0_i32 = arith.constant 0 : i32
    %c0_i32_0 = arith.constant 0 : i32
    %c0_i32_1 = arith.constant 0 : i32
    return %arg0, %arg1, %c0_i32, %c0_i32_0 : i32, i32, i32, i32
  }
}

</mosaic_0001>

<bundles_post_ra>
// kernel: tpu_custom_call.1
= control target key start
LH: loop header
LB: loop body
LE: loop exit
PB: predicated region body
PF: predicated region fallthrough
CT: control target
= control target key end

     0   :  { %s2320_s0 = inlined_call_operand.hbm [shape: f32[216], index: 0, kind: input, shape index: {}]   ;;  %s2321_s1 = inlined_call_operand.vmem [shape: f32[32], index: 1, kind: input, shape index: {}]   ;;  %s2322_s2 = inlined_call_operand.hbm [shape: f32[9,256], index: 2, kind: input, shape index: {}]   ;;  %s2323_s3 = inlined_call_operand.hbm [shape: f32[2,8,16,256], index: 3, kind: input, shape index: {}]   ;;  %s2324_s4 = inlined_call_operand.hbm [shape: f32[2,8,16,256], index: 4, kind: output, shape index: {}]  }
   0x1   :  { %2361 = sst [smem:[#allocation51_spill]] %s2320_s0 }
   0x2   :  { %2362 = sst [smem:[#allocation52_spill]] %s2321_s1 }
   0x3   :  { %2363 = sst [smem:[#allocation53_spill]] %s2322_s2 }
   0x4   :  { %2364 = sst [smem:[#allocation54_spill]] %s2323_s3 }
   0x5   :  { %9 = vsyncpa [#allocation5], 0 }
   0x6   :  { %10 = vsyncpa [#allocation6], 0 }
   0x7   :  { %11 = vsyncpa [#allocation3], 0 }
   0x8   :  { %12 = vsyncpa [#allocation10], 0 }
   0x9   :  { %14 = vsyncpa [#allocation10 + $0x1], 0 }
   0xa   :  { %15 = vsyncpa [#allocation4], 0 }
   0xb   :  { %17 = vsyncpa [#allocation4 + $0x1], 0  ;;  %s1494_s15 = smov 0   ;;  %s1496_s16 = smov 0  }
   0xc   :  { %s1498_s17 = smov 0   ;;  %s1500_s18 = smov 0  }
   0xd   :  { %s1502_s19 = smov 0   ;;  %s1504_s20 = smov 0  }
   0xe LB: > { %2365 = sst [smem:[#allocation17_spill]] %s1425_s15  ;;  %s1109_s21 = sadd.s32 4294967295, %s1445_s20   ;;  %s1445_s20 = sphi %s1504_s20, %s23_s20   ;;  %s1441_s19 = sphi %s1502_s19, %s2452_s19   ;;  %s1437_s18 = sphi %s1500_s18, %s2451_s18   ;;  %s1433_s17 = sphi %s1498_s17, %s2450_s17   ;;  %s1429_s16 = sphi %s1496_s16, %s2449_s16   ;;  %s1425_s15 = sphi %s1494_s15, %s2448_s15  }
   0xf   : > { %2366 = sst [smem:[#allocation18_spill]] %s1429_s16  ;;  %s1110_s22 = sadd.s32 4294967294, %s1445_s20  }
  0x10   : > { %2367 = sst [smem:[#allocation19_spill]] %s1433_s17  ;;  %p120_p0 = scmp.ne.s32.totalorder %s1429_s16, %s1425_s15 }
  0x11   : > { %2368 = sst [smem:[#allocation20_spill]] %s1441_s19  ;;  %p1528_p1 = scmp.eq.s32.totalorder %s1109_s21, 0 }
  0x12   : > { %2369 = sst [smem:[#allocation21_spill]] %s1445_s20  ;;  %p1532_p2 = scmp.eq.s32.totalorder %s1109_s21, 1 }
  0x13   : > { %s2370_s23 = scalar_select %p1528_p1, 1, 0 }
  0x14   : > { %p152_p3 = scmp.eq.s32.totalorder %s1110_s22, 1  ;;  %p1538_p4 = por %p1528_p1, %p120_p0 }
  0x15   : > { %p1111_p5 = scmp.ge.s32.totalorder %s1445_s20, 1  ;;  %p159_p7 = scmp.lt.s32.totalorder %s1445_s20, 3 }
  0x16   : > { %s2372_s25 = scalar_select %p1538_p4, 1, 0 }
  0x17   : > { %p1543_p6 = por %p152_p3, %p120_p0  ;;  %p1548_p8 = pnand %p1111_p5, %p159_p7 }
  0x18   : > { %s2376_s1 = sld [smem:[#allocation52_spill]]  ;;  %s1451_s6 = smov [#allocation8]  }
  0x19   : > { %s2373_s26 = scalar_select %p1543_p6, 1, 0 }
  0x1a   : > { %p1161_p10 = pneg %p1548_p8  ;;  %s191_s7 = sshll.u32 %s1451_s6, 4  ;;  %s1564_s7 = int_to_ptr.vmem [resolvable:$true] %s191_s7 }
  0x1b   : > { %2374 = sst [smem:[#allocation22_spill]] %s2373_s26  ;;  %s2378_s0 = sld [smem:[#allocation51_spill]] }
  0x1c   : > { %p1560_p11 = pnand %p1161_p10, %p1528_p1 }
  0x1e   : > { %s181_s30 = sshll.u32 %s2376_s1, 4  ;;  %p1263_p13 = pneg %p1560_p11  ;;  %s182_s30 = int_to_ptr.vmem [resolvable:$true] %s181_s30 }
  0x21   : > { %s1261_s10 = scalar_lea.hbm %s2378_s0, 32 }
  0x22   : > { %p1262_p12 = scmp.ne.s32.totalorder %s2378_s0, %s1261_s10  ;;  %p1268_p5 = scmp.lt.u32.totalorder %s1261_s10, %s2378_s0 }
  0x24   : > { %p1264_p0 = pnand %p1263_p13, %p1262_p12 }
  0x26   : > { %p1265_p3 = pneg %p1264_p0 }
  0x28   : > { %p1270_p7 = pnand %p1268_p5, %p1265_p3 }
  0x2a   : > { %1273 = shalt.err (!%p1270_p7)
}
  0x2b   : > { %s1452_s21 = smov [#allocation2]   ;;  %s1274_s29 = scalar_lea.vmem %s182_s30, 16 }
  0x2c   : > { %1164 = dma.hbm_to_smem (!%p1560_p11), %s2378_s0, 32, %s1452_s21, [#allocation5]  }
  0x2d   : > { %p1275_p10 = scmp.ne.s32.totalorder %s182_s30, %s1274_s29  ;;  %p1282_p9 = scmp.lt.s32.totalorder %s182_s30, %s182_s30 }
  0x2e   : > { %p1283_p6 = scmp.lt.s32.totalorder %s1274_s29, %s1274_s29 }
  0x2f   : > { %p1277_p12 = pnand %p1275_p10, %p1263_p13 }
  0x30   : > { %p1284_p4 = por %p1283_p6, %p1282_p9 }
  0x31   : > { %p1278_p0 = pneg %p1277_p12 }
  0x33   : > { %p1285_p1 = pnand %p1284_p4, %p1278_p0 }
  0x35   : > { %1288 = shalt.err (!%p1285_p1)
}
  0x36   : > { %s1453_s6 = smov [#allocation7]   ;;  %s2379_s2 = sld [smem:[#allocation53_spill]] }
  0x37   : > { %1167 = dma.vmem_to_smem (!%p1560_p11), %s182_s30, 16, %s1453_s6, [#allocation6]  }
  0x3c   : > { %s1289_s10 = scalar_lea.hbm %s2379_s2, 512 }
  0x3d   : > { %p1290_p3 = scmp.ne.s32.totalorder %s2379_s2, %s1289_s10  ;;  %p1296_p1 = scmp.lt.u32.totalorder %s1289_s10, %s2379_s2 }
  0x3f   : > { %p1292_p5 = pnand %p1290_p3, %p1263_p13 }
  0x41   : > { %p1293_p7 = pneg %p1292_p5 }
  0x43   : > { %p1298_p4 = pnand %p1296_p1, %p1293_p7 }
  0x45   : > { %1301 = shalt.err (!%p1298_p4)
}
  0x46   : > { %s1302_s30 = scalar_lea.vmem %s1564_s7, 512  ;;  %p1310_p12 = scmp.lt.s32.totalorder %s1564_s7, %s1564_s7 }
  0x47   : > { %p1303_p6 = scmp.ne.s32.totalorder %s1564_s7, %s1302_s30  ;;  %p1311_p0 = scmp.lt.s32.totalorder %s1302_s30, %s1302_s30 }
  0x49   : > { %p1305_p9 = pnand %p1303_p6, %p1263_p13  ;;  %p1312_p3 = por %p1311_p0, %p1310_p12 }
  0x4b   : > { %p1306_p10 = pneg %p1305_p9 }
  0x4d   : > { %p1313_p5 = pnand %p1312_p3, %p1306_p10 }
  0x4f   : > { %1316 = shalt.err (!%p1313_p5)
}
  0x50   : > { %s1454_s21 = smov 256   ;;  %s1455_s22 = smov 16  }
  0x51   : > { %1170 = dma.hbm_to_vmem [thread:$0]  (!%p1560_p11), %s2379_s2, 512, %s1564_s7, [#allocation3], %s1454_s21, %s1454_s21, %s1455_s22  }
  0x52   : > { %s107_s6 = sadd.s32 1, %s1433_s17  ;;  %s35_s8 = sadd.s32 1, %s1441_s19 }
  0x53   : > { %p114_p13 = scmp.ne.s32.totalorder %s1433_s17, %s1429_s16  ;;  %p37_p7 = scmp.ge.s32.totalorder %s35_s8, 2 }
  0x54   : > { %p115_p1 = scmp.eq.s32.totalorder %s1445_s20, 0  ;;  %p1182_p6 = scmp.lt.s32.totalorder %s1445_s20, 2 }
  0x55   : > { %p1625_p4 = por %p1532_p2, %p114_p13  ;;  %s2454_s8 = smov (%p37_p7, %s35_s8), 0 }
  0x56   : > { %2381 = sst [smem:[#allocation23_spill]] %s2454_s8  ;;  %p116_p9 = por %p115_p1, %p114_p13 }
  0x57   : > { %s2380_s9 = scalar_select %p1625_p4, 1, 0 }
  0x58   : > { %s205_s5 = sand.u32 1, %s1433_s17   ;;  %s102_s10 = ssub.s32 %s1441_s19, %s2454_s8 }
  0x59   : > { %p105_p10 = scmp.eq.s32.totalorder %s102_s10, 0  ;;  %s1116_s7 = sshll.u32 %s205_s5, 8 }
  0x5a   : > { %s1135_s11 = sshll.u32 %s1441_s19, 12  ;;  %s2383_s3 = sld [smem:[#allocation54_spill]] }
  0x5b   : > { %s1637_s12 = scalar_select %p105_p10, %s1433_s17, %s107_s6  }
  0x5c   : > { %s209_s30 = scalar_lea.vmem [#allocation9], %s1116_s7  ;;  %p1648_p2 = pnand %p1182_p6, %p116_p9 }
  0x5d   : > { %2382 = sst [smem:[#allocation24_spill]] %s1637_s12  ;;  %s219_s28 = sshll.u32 %s209_s30, 4  ;;  %s1644_s28 = int_to_ptr.vmem [resolvable:$true] %s219_s28 }
  0x5e   : > { %s1652_s6 = scalar_lea.sflag [#allocation10], %s205_s5  ;;  %p1319_p12 = pneg %p1648_p2 }
  0x60   : > { %s1642_s24 = scalar_lea.hbm %s2383_s3, %s1135_s11  ;;  %s1322_s13 = scalar_lea.hbm %s2383_s3, 8192 }
  0x61   : > { %s1317_s10 = scalar_lea.hbm %s1642_s24, 4096  ;;  %p1323_p5 = scmp.lt.u32.totalorder %s1642_s24, %s2383_s3 }
  0x62   : > { %p1318_p11 = scmp.ne.s32.totalorder %s1642_s24, %s1317_s10  ;;  %p1324_p13 = scmp.lt.u32.totalorder %s1322_s13, %s1317_s10 }
  0x63   : > { %p1326_p1 = scmp.lt.u32.totalorder %s1317_s10, %s1642_s24 }
  0x64   : > { %p1320_p0 = pnand %p1319_p12, %p1318_p11  ;;  %p1325_p7 = por %p1324_p13, %p1323_p5 }
  0x66   : > { %p1321_p3 = pneg %p1320_p0  ;;  %p1327_p6 = por %p1326_p1, %p1325_p7 }
  0x68   : > { %p1328_p9 = pnand %p1327_p6, %p1321_p3 }
  0x6a   : > { %1331 = shalt.err (!%p1328_p9)
}
  0x6b   : > { %s1332_s5 = scalar_lea.vmem %s1644_s28, 4096  ;;  %s1456_s7 = smov [#allocation9]  }
  0x6c   : > { %p1333_p10 = scmp.ne.s32.totalorder %s1644_s28, %s1332_s5  ;;  %s1337_s11 = sshll.u32 %s1456_s7, 4  ;;  %s1338_s11 = int_to_ptr.vmem [resolvable:$false] %s1337_s11 }
  0x6d   : > { %s1339_s14 = scalar_lea.vmem %s1338_s11, 8192  ;;  %p1340_p4 = scmp.lt.s32.totalorder %s1644_s28, %s1338_s11 }
  0x6e   : > { %p1335_p11 = pnand %p1333_p10, %p1319_p12  ;;  %p1341_p5 = scmp.lt.s32.totalorder %s1339_s14, %s1332_s5 }
  0x70   : > { %p1336_p0 = pneg %p1335_p11  ;;  %p1342_p13 = por %p1341_p5, %p1340_p4 }
  0x72   : > { %p1343_p7 = pnand %p1342_p13, %p1336_p0 }
  0x74   : > { %1346 = shalt.err (!%p1343_p7)
}
  0x75   : > { %1174 = dma.hbm_to_vmem [thread:$0]  (!%p1648_p2), %s1642_s24, 4096, %s1644_s28, %s1652_s6, %s1454_s21, %s1454_s21, %s1455_s22  }
  0x76   : > { %231 = sbr.rel (%p1548_p8) target bundleno = 875 (0x36b), region = 36 }
  0x7d   : > { %p2385_p12 = scmp.ne.s32.totalorder %s2370_s23, 0 }
  0x7f   : > { %1404 = dma.done.wait (%p2385_p12), [#allocation5], 32  }
  0x80   : > { %1406 = vsyncadd (%p2385_p12), [#allocation5], 4294967264 }
  0x81   : > { %1408 = dma.done.wait (%p2385_p12), [#allocation6], 16  }
  0x82   : > { %1410 = vsyncadd (%p2385_p12), [#allocation6], 4294967280 }
  0x83   : > { %1412 = dma.done.wait (%p2385_p12), [#allocation3], 512  }
  0x84   : > { %1414 = vsyncadd (%p2385_p12), [#allocation3], 4294966784  ;;  %s1698_s27 = sand.u32 1, %s1429_s16   ;;  %p2387_p8 = scmp.ne.s32.totalorder %s2372_s25, 0 }
  0x85   : > { %s1123_s21 = sshll.u32 %s1698_s27, 8  ;;  %s246_s22 = scalar_lea.sflag [#allocation10], %s1698_s27 }
  0x86   : > { %s1702_s24 = scalar_lea.vmem [#allocation9], %s1123_s21 }
  0x87   : > { %2386 = sst [smem:[#allocation25_spill]] %s1702_s24 }
  0x88   : > { %1416 = dma.done.wait (%p2387_p8), %s246_s22, 4096  }
  0x89   : > { %1418 = vsyncadd (%p2387_p8), %s246_s22, 4294963200 }
  0x8a   : > { %254 = sfence }
  0x8b   : > { %v2338_v0 = vlaneseq  ;;  %v1457_v3 = vmov 0.0   ;;  %s1717_s23 = scalar_lea.vmem [#allocation11], %s1123_s21  ;;  %s1719_s28 = smov 0  }
  0x8d   : > { %v1709_v1 = vshrl.u32 %v2338_v0, 7 }
  0x8f   : > { %2388 = vst [vmem:[#allocation26_spill] sm:$0xff] %v1709_v1  ;;  %v279_v2 = vadd.s32 8, %v1709_v1  ;;  %vm280_vm0 = vcmp.ge.s32.totalorder %v1709_v1, 1 }
  0x90   : > { %v1713_v4 = vsel %vm280_vm0, 1.0, %v1457_v3 }
  0x91   : > { %2389 = vst [vmem:[#allocation27_spill] sm:$0xff] %v1713_v4  ;;  %vm287_vm1 = vcmp.lt.s32.totalorder %v279_v2, 15 }
  0x92   : > { %v1715_v5 = vsel %vm287_vm1, 1.0, %v1457_v3 }
  0x93   : > { %2390 = vst [vmem:[#allocation28_spill] sm:$0xff] %v1715_v5 }
  0x94 LB: >> { %s2392_s24 = sld [smem:[#allocation25_spill]]  ;;  %s2329_s25 = sshll.u32 %s1449_s28, 5  ;;  %v2393_v0 = vlaneseq  ;;  %v322_v12 = vld [vmem:[#allocation8] ss:$8 sm:$0x3]  ;;  %s1449_s28 = sphi %s1719_s28, %s297_s28  }
  0x95   : >> { %s1458_s6 = smov 17   ;;  %s1459_s10 = smov 16   ;;  %v385_v14 = vld [vmem:[#allocation8 + $0x1] ss:$8 sm:$0x3] }
  0x96   : >> { %v2391_v1 = vld [vmem:[#allocation26_spill] sm:$0xff]  ;;  %s1460_s13 = smov 15   ;;  %s1461_s30 = smov 1   ;;  %v1813_v10 = vand.u32 127, %v2393_v0 }
  0x97   : >> { %s1462_s5 = smov 127   ;;  %s1463_s7 = smov 113   ;;  %v1816_v11 = vsub.s32 0, %v2391_v1  ;;  %v1822_v13 = vsub.s32 1, %v2391_v1 }
  0x98   : >> { %s1464_s11 = smov 112   ;;  %s1465_s14 = smov 111   ;;  %v448_v15 = vld [vmem:[#allocation8 + $0x2] ss:$8 sm:$0x3]  ;;  %vm317_vm2 = vcmp.lt.s32.totalorder %v1813_v10, 17 }
  0x99   : >> { %s1769_s21 = smul.u32 27, %s1449_s28  ;;  %v1837_v16 = vrot.slane %v322_v12, %v1816_v11  ;;  %v1842_v17 = vrot.slane %v322_v12, %v1822_v13  ;;  %v1848_v19 = vrot.slane %v385_v14, %v1816_v11  ;;  %v1851_v20 = vrot.slane %v385_v14, %v1822_v13  ;;  %v511_v27 = vld [vmem:[#allocation8 + $0x3] ss:$8 sm:$0x3] }
  0x9a   : >> { %s302_s29 = scalar_lea.vmem %s2392_s24, %s2329_s25  ;;  %v1862_v25 = vrot.slane %v448_v15, %v1816_v11  ;;  %v1865_v26 = vrot.slane %v448_v15, %v1822_v13  ;;  %vm379_vm3 = vcmp.lt.s32.totalorder %v1813_v10, 16  ;;  %v607_v36 = vld [vmem:[#allocation8 + $0x5] ss:$8 sm:$0x3]  ;;  %v1901_v38 = vrot.slane %v511_v27, %v1816_v11 }
  0x9b   : >> { %v1728_v6 = vld [vmem:[%s302_s29 + $0x8] sm:$0xff]  ;;  %v1730_v7 = vld [vmem:[%s302_s29] sm:$0xff]  ;;  %v1734_v8 = vld [vmem:[%s302_s29 + $0x18] sm:$0xff]  ;;  %s349_s22 = sadd.s32 9, %s1769_s21  ;;  %s475_s25 = sadd.s32 11, %s1769_s21  ;;  %v1904_v39 = vrot.slane %v511_v27, %v1822_v13  ;;  %v1936_v50 = vrot.slane %v607_v36, %v1816_v11  ;;  %v1942_v53 = vrot.slane %v607_v36, %v1822_v13  ;;  %vm442_vm4 = vcmp.lt.s32.totalorder %v1813_v10, 15 }
  0x9c   : >> { %311 = vrot.lane.b32.xlu1 %v1728_v6, %s1458_s6  ;;  %307 = vrot.lane.b32.xlu0 %v1730_v7, %s1458_s6  ;;  %v1736_v9 = vld [vmem:[%s302_s29 + $0x10] sm:$0xff]  ;;  %s360_s29 = sadd.s32 18, %s1769_s21  ;;  %s486_s0 = sadd.s32 20, %s1769_s21  ;;  %v670_v51 = vld [vmem:[#allocation8 + $0x6] ss:$8 sm:$0x3] }
  0x9d   : >> { %s1795_s3 = sld [smem:[#allocation2 + %s475_s25]]  ;;  %s560_s8 = sadd.s32 4, %s1769_s21  ;;  %v1978_v3 = vrot.slane %v670_v51, %v1816_v11  ;;  %v796_v14 = vld [vmem:[#allocation8 + $0x10] ss:$8 sm:$0x3]  ;;  %vm505_vm5 = vcmp.lt.s32.totalorder %v1813_v10, 1 }
  0x9e   : >> { %s1797_s24 = sld [smem:[#allocation2 + %s486_s0]]  ;;  %s538_s12 = sadd.s32 12, %s1769_s21  ;;  %v2019_v4 = vrot.slane %v796_v14, %v1816_v11  ;;  %vm601_vm6 = vcmp.lt.s32.totalorder %v1813_v10, 127  ;;  %vm664_vm7 = vcmp.lt.s32.totalorder %v1813_v10, 113  ;;  %vm727_vm8 = vcmp.lt.s32.totalorder %v1813_v10, 112 }
  0x9f   : >> { %s549_s17 = sadd.s32 21, %s1769_s21  ;;  %s582_s16 = sadd.s32 22, %s1769_s21  ;;  %2401 = vst [vmem:[#allocation36_spill] sm:$0xff] %v1978_v3  ;;  %vm790_vm9 = vcmp.lt.s32.totalorder %v1813_v10, 111 }
  0xa0   : >> { %313 = vrot.lane.b32.xlu1 %v1734_v8, %s1458_s6  ;;  %309 = vrot.lane.b32.xlu0 %v1736_v9, %s1458_s6  ;;  %s1774_s6 = sld [smem:[#allocation2 + %s1769_s21]]  ;;  %s645_s25 = sadd.s32 23, %s1769_s21  ;;  %2411 = vst [vmem:[#allocation46_spill] sm:$0xff] %v2019_v4 }
  0xa1   : >> { %s1806_s20 = sld [smem:[#allocation2 + %s560_s8]]  ;;  %s686_s15 = sadd.s32 6, %s1769_s21 }
  0xa2   : >> { %s1818_s0 = sld [smem:[#allocation2 + %s582_s16]] }
  0xa3   : >> { %s1824_s8 = sld [smem:[#allocation2 + %s538_s12]]  ;;  %s697_s12 = sadd.s32 15, %s1769_s21  ;;  %v1889_v33 = vstv %s1795_s3 }
  0xa4   : >> { %373 = vrot.lane.b32.xlu1 %v1736_v9, %s1459_s10  ;;  %371 = vrot.lane.b32.xlu0 %v1730_v7, %s1459_s10  ;;  %s1832_s16 = sld [smem:[#allocation2 + %s645_s25]]  ;;  %s771_s25 = sadd.s32 25, %s1769_s21  ;;  %v1898_v37 = vstv %s1797_s24 }
  0xa5   : >> { %s1909_s3 = sld [smem:[#allocation2 + %s771_s25]]  ;;  %s834_s24 = sadd.s32 26, %s1769_s21 }
  0xa6   : >> { %v1845_v18 = vstv %s1774_s6  ;;  %s1867_s6 = sld [smem:[#allocation2 + %s686_s15]]  ;;  %s812_s15 = sadd.s32 8, %s1769_s21 }
  0xa7   : >> { %v562_v31 = vstv %s1806_s20  ;;  %s823_s20 = sadd.s32 17, %s1769_s21 }
  0xa8   : >> { %377 = vrot.lane.b32.xlu1 %v1734_v8, %s1459_s10  ;;  %375 = vrot.lane.b32.xlu0 %v1728_v6, %s1459_s10  ;;  %s401_s10 = sadd.s32 1, %s1769_s21  ;;  %v584_v35 = vstv %s1818_s0  ;;  %v1919_v45 = vmul.f32 %v562_v31, %v1736_v9  ;;  %v1922_v46 = vmul.f32 %v562_v31, %v1734_v8  ;;  %v1945_v54 = vmul.f32 %v562_v31, %v1728_v6 }
  0xa9   : >> { %v1913_v43 = vstv %s1824_s8  ;;  %v1933_v49 = vmul.f32 %v584_v35, %v1736_v9  ;;  %v1939_v52 = vmul.f32 %v584_v35, %v1734_v8  ;;  %v1953_v56 = vmul.f32 %v584_v35, %v1728_v6 }
  0xaa   : >> { %v1956_v57 = vmul.f32 %v562_v31, %v1730_v7  ;;  %v1962_v59 = vmul.f32 %v584_v35, %v1730_v7  ;;  %v1975_v2 = vstv %s1832_s16  ;;  %s932_s16 = sadd.s32 16, %s1449_s28 }
  0xab   : >> { %2395 = vst [vmem:[#allocation30_spill] sm:$0xff] %v1953_v56  ;;  %2400 = vst [vmem:[#allocation35_spill] sm:$0xff] %v1975_v2  ;;  %v2016_v5 = vstv %s1909_s3 }
  0xac   : >> { %436 = vrot.lane.b32.xlu1 %v1736_v9, %s1460_s13  ;;  %434 = vrot.lane.b32.xlu0 %v1730_v7, %s1460_s13  ;;  %2396 = vst [vmem:[#allocation31_spill] sm:$0xff] %v1956_v57  ;;  %2398 = vst [vmem:[#allocation33_spill] sm:$0xff] %v1962_v59  ;;  %v1988_v12 = vstv %s1867_s6 }
  0xad   : >> { %2403 = vst [vmem:[#allocation38_spill] sm:$0xff] %v1988_v12  ;;  %2410 = vst [vmem:[#allocation45_spill] sm:$0xff] %v2016_v5 }
  0xb0   : >> { %440 = vrot.lane.b32.xlu1 %v1734_v8, %s1460_s13  ;;  %438 = vrot.lane.b32.xlu0 %v1728_v6, %s1460_s13  ;;  %s1777_s13 = sld [smem:[#allocation2 + %s349_s22]] }
  0xb4   : >> { %499 = vrot.lane.b32.xlu1 %v1736_v9, %s1461_s30  ;;  %497 = vrot.lane.b32.xlu0 %v1730_v7, %s1461_s30 }
  0xb6   : >> { %v1856_v22 = vstv %s1777_s13  ;;  %s1880_s13 = sld [smem:[#allocation2 + %s697_s12]] }
  0xb8   : >> { %503 = vrot.lane.b32.xlu1 %v1734_v8, %s1461_s30  ;;  %501 = vrot.lane.b32.xlu0 %v1728_v6, %s1461_s30  ;;  %s1779_s30 = sld [smem:[#allocation2 + %s360_s29]]  ;;  %s527_s29 = sadd.s32 3, %s1769_s21 }
  0xb9   : >> { %s1801_s19 = sld [smem:[#allocation2 + %s527_s29]] }
  0xba   : >> { %s1826_s29 = sld [smem:[#allocation2 + %s549_s17]]  ;;  %s708_s17 = sadd.s32 24, %s1769_s21 }
  0xbc   : >> { %595 = vrot.lane.b32.xlu1 %v1736_v9, %s1462_s5  ;;  %593 = vrot.lane.b32.xlu0 %v1730_v7, %s1462_s5  ;;  %v1996_v31 = vstv %s1880_s13  ;;  %s2441_s13 = sshll.u32 %s1449_s28, 5 }
  0xbd   : >> { %2404 = vst [vmem:[#allocation39_spill] sm:$0xff] %v1996_v31 }
  0xbe   : >> { %v1859_v23 = vstv %s1779_s30  ;;  %s1882_s30 = sld [smem:[#allocation2 + %s708_s17]]  ;;  %s939_s17 = sadd.s32 24, %s1449_s28 }
  0xbf   : >> { %v1907_v40 = vstv %s1801_s19  ;;  %s1950_s19 = sld [smem:[#allocation2 + %s812_s15]] }
  0xc0   : >> { %599 = vrot.lane.b32.xlu1 %v1734_v8, %s1462_s5  ;;  %597 = vrot.lane.b32.xlu0 %v1728_v6, %s1462_s5  ;;  %s412_s5 = sadd.s32 10, %s1769_s21  ;;  %v1916_v44 = vstv %s1826_s29 }
  0xc1   : >> { %s1788_s1 = sld [smem:[#allocation2 + %s412_s5]] }
  0xc4   : >> { %658 = vrot.lane.b32.xlu1 %v1736_v9, %s1463_s7  ;;  %656 = vrot.lane.b32.xlu0 %v1730_v7, %s1463_s7 }
  0xc7   : >> { %v1874_v29 = vstv %s1788_s1 }
  0xc8   : >> { %662 = vrot.lane.b32.xlu1 %v1734_v8, %s1463_s7  ;;  %660 = vrot.lane.b32.xlu0 %v1728_v6, %s1463_s7  ;;  %s423_s7 = sadd.s32 19, %s1769_s21 }
  0xc9   : >> { %s1790_s2 = sld [smem:[#allocation2 + %s423_s7]]  ;;  %s623_s7 = sadd.s32 5, %s1769_s21 }
  0xcc   : >> { %721 = vrot.lane.b32.xlu1 %v1736_v9, %s1464_s11  ;;  %719 = vrot.lane.b32.xlu0 %v1730_v7, %s1464_s11 }
  0xcf   : >> { %v1877_v30 = vstv %s1790_s2 }
  0xd0   : >> { %725 = vrot.lane.b32.xlu1 %v1734_v8, %s1464_s11  ;;  %723 = vrot.lane.b32.xlu0 %v1728_v6, %s1464_s11  ;;  %s1783_s11 = sld [smem:[#allocation2 + %s401_s10]]  ;;  %s571_s10 = sadd.s32 13, %s1769_s21 }
  0xd1   : >> { %s1808_s5 = sld [smem:[#allocation2 + %s571_s10]] }
  0xd2   : >> { %s1828_s10 = sld [smem:[#allocation2 + %s623_s7]]  ;;  %s749_s7 = sadd.s32 7, %s1769_s21 }
  0xd3   : >> { %s1893_s1 = sld [smem:[#allocation2 + %s749_s7]] }
  0xd4   : >> { %784 = vrot.lane.b32.xlu1 %v1736_v9, %s1465_s14  ;;  %782 = vrot.lane.b32.xlu0 %v1730_v7, %s1465_s14  ;;  %s933_s7 = sld [smem:[#allocation7 + %s932_s16]] }
  0xd6   : >> { %v1871_v28 = vstv %s1783_s11  ;;  %s1966_s11 = sld [smem:[#allocation2 + %s834_s24]] }
  0xd7   : >> { %v573_v34 = vstv %s1808_s5 }
  0xd8   : >> { %788 = vrot.lane.b32.xlu1 %v1734_v8, %s1465_s14  ;;  %786 = vrot.lane.b32.xlu0 %v1728_v6, %s1465_s14  ;;  %s464_s14 = sadd.s32 2, %s1769_s21  ;;  %v1927_v47 = vmul.f32 %v573_v34, %v1736_v9  ;;  %v1930_v48 = vmul.f32 %v573_v34, %v1734_v8  ;;  %v1948_v55 = vmul.f32 %v573_v34, %v1728_v6  ;;  %v1969_v62 = vstv %s1828_s10  ;;  %v733_v6 = vld [vmem:[#allocation8 + $0x7] ss:$8 sm:$0x3]  ;;  %s924_s10 = sadd.s32 8, %s1449_s28 }
  0xd9   : >> { %s1792_s22 = sld [smem:[#allocation2 + %s464_s14]]  ;;  %s634_s14 = sadd.s32 14, %s1769_s21  ;;  %v1959_v58 = vmul.f32 %v573_v34, %v1730_v7  ;;  %v1985_v9 = vrot.slane %v670_v51, %v1822_v13  ;;  %v1999_v34 = vstv %s1882_s30  ;;  %v2008_v35 = vstv %s1893_s1 }
  0xda   : >> { %s1830_s26 = sld [smem:[#allocation2 + %s634_s14]]  ;;  %s760_s14 = sadd.s32 16, %s1769_s21  ;;  %2394 = vst [vmem:[#allocation29_spill] sm:$0xff] %v1948_v55  ;;  %2405 = vst [vmem:[#allocation40_spill] sm:$0xff] %v1999_v34 }
  0xdb   : >> { %s1895_s2 = sld [smem:[#allocation2 + %s760_s14]]  ;;  %2397 = vst [vmem:[#allocation32_spill] sm:$0xff] %v1959_v58  ;;  %2402 = vst [vmem:[#allocation37_spill] sm:$0xff] %v1985_v9  ;;  %s955_s30 = scalar_lea.vmem %s1717_s23, %s2441_s13 [#allocation11] }
  0xdc   : >> { %s1964_s21 = sld [smem:[#allocation2 + %s823_s20]]  ;;  %2408 = vst [vmem:[#allocation43_spill] sm:$0xff] %v2008_v35 }
  0xdd   : >> { %s925_s12 = sld [smem:[#allocation7 + %s924_s10]] }
  0xde   : >> { %s940_s14 = sld [smem:[#allocation7 + %s939_s17]] }
  0xdf   : >> { %v1886_v32 = vstv %s1792_s22 }
  0xe0   : >> { %v1972_v63 = vstv %s1830_s26  ;;  %s879_s26 = sld [smem:[#allocation7 + %s1449_s28]]  ;;  %s297_s28 = sadd.s32 1, %s1449_s28  }
  0xe1   : >> { %2399 = vst [vmem:[#allocation34_spill] sm:$0xff] %v1972_v63  ;;  %v2011_v36 = vstv %s1895_s2  ;;  %p294_p4 = scmp.ge.s32.totalorder %s297_s28, 8  }
  0xe2   : >> { %2409 = vst [vmem:[#allocation44_spill] sm:$0xff] %v2011_v36  ;;  %s1138_s1 = sshll.u32 (%p294_p4), %s1437_s18, 12  ;;  %s977_s20 = sshll.u32 (%p294_p4), %s1717_s23, 4  ;;  %s2271_s20 = int_to_ptr.vmem [resolvable:$true] %s977_s20 }
  0xe3   : > { %s2268_s15 = scalar_lea.hbm (%p294_p4), %s2324_s4, %s1138_s1  ;;  %s961_s24 = scalar_lea.sflag (%p294_p4), [#allocation4], %s1698_s27 }
  0xe4   : > { %p2442_p3 = scmp.ne.s32.totalorder (%p294_p4), %s2380_s9, 0  ;;  %s1466_s28 = smov (%p294_p4), [#allocation11]  }
 0x10e   : >> { %v312_v21 = vpop.permute.xlu1 %311  ;;  %v308_v24 = vpop.permute.xlu0 %307 }
 0x10f   : >> { %v318_v7 = vsel %vm317_vm2, %v308_v24, %v312_v21  ;;  %v320_v8 = vsel %vm317_vm2, %v312_v21, %v308_v24  ;;  %v2002_v21 = vrot.slane %v733_v6, %v1816_v11  ;;  %v2005_v24 = vrot.slane %v733_v6, %v1822_v13 }
 0x110   : >> { %v334_v51 = vmul.f32 %v1837_v16, %v320_v8 }
 0x111   : >> { %2406 = vst [vmem:[#allocation41_spill] sm:$0xff] %v2002_v21  ;;  %2407 = vst [vmem:[#allocation42_spill] sm:$0xff] %v2005_v24 }
 0x112   : >> { %v314_v41 = vpop.permute.xlu1 %313  ;;  %v310_v42 = vpop.permute.xlu0 %309 }
 0x113   : >> { %v319_v15 = vsel %vm317_vm2, %v310_v42, %v314_v41  ;;  %v321_v27 = vsel %vm317_vm2, %v314_v41, %v310_v42  ;;  %v335_v41 = vmul.f32 %v1842_v17, %v318_v7 }
 0x114   : >> { %v336_v6 = vmul.f32 %v1837_v16, %v321_v27  ;;  %v337_v1 = vmul.f32 %v1842_v17, %v319_v15  ;;  %v2034_v16 = vrot.slane %v796_v14, %v1822_v13  ;;  %v2037_v17 = vstv %s1950_s19  ;;  %s1347_s19 = scalar_lea.vmem (%p294_p4), %s2271_s20, 4096 }
 0x115   : >> { %2413 = vst [vmem:[#allocation48_spill] sm:$0xff] %v2037_v17  ;;  %v2040_v15 = vstv %s1964_s21  ;;  %v2043_v27 = vstv %s1966_s11  ;;  %v364_v13 = vmul.f32 %v1859_v23, %v335_v41  ;;  %p1348_p2 = scmp.ne.s32.totalorder (%p294_p4), %s2271_s20, %s1347_s19  ;;  %s1351_s21 = sshll.u32 (%p294_p4), %s1466_s28, 4  ;;  %s1352_s21 = int_to_ptr.vmem [resolvable:$false] %s1351_s21 }
 0x116   : >> { %v374_v60 = vpop.permute.xlu1 %373  ;;  %v372_v61 = vpop.permute.xlu0 %371  ;;  %2412 = vst [vmem:[#allocation47_spill] sm:$0xff] %v2034_v16  ;;  %2414 = vst [vmem:[#allocation49_spill] sm:$0xff] %v2040_v15  ;;  %v344_v15 = vmul.f32 %v1845_v18, %v337_v1  ;;  %v354_v21 = vmul.f32 %v1856_v22, %v336_v6  ;;  %v355_v34 = vmul.f32 %v1856_v22, %v337_v1  ;;  %s1353_s18 = scalar_lea.vmem (%p294_p4), %s1352_s21, 8192  ;;  %p1354_p9 = scmp.lt.s32.totalorder (%p294_p4), %s2271_s20, %s1352_s21 }
 0x117   : >> { %2415 = vst [vmem:[#allocation50_spill] sm:$0xff] %v2043_v27  ;;  %v343_v27 = vmul.f32 %v1845_v18, %v336_v6  ;;  %p1349_p1 = pnand (%p294_p4), %p1348_p2, %p2442_p3  ;;  %p1355_p10 = scmp.lt.s32.totalorder (%p294_p4), %s1353_s18, %s1347_s19 }
 0x119   : > { %p1350_p6 = pneg (%p294_p4), %p1349_p1  ;;  %p1356_p11 = por (%p294_p4), %p1355_p10, %p1354_p9 }
 0x11a   : >> { %v378_v42 = vpop.permute.xlu1 %377  ;;  %v376_v0 = vpop.permute.xlu0 %375 }
 0x11b   : >> { %v381_v36 = vsel %vm379_vm3, %v374_v60, %v378_v42  ;;  %v383_v8 = vsel %vm379_vm3, %v378_v42, %v374_v60  ;;  %v380_v5 = vsel %vm379_vm3, %v372_v61, %v376_v0  ;;  %v382_v11 = vsel %vm379_vm3, %v376_v0, %v372_v61  ;;  %p1357_p0 = pnand (%p294_p4), %p1356_p11, %p1350_p6 }
 0x11c   : >> { %v399_v7 = vmul.f32 %v1848_v19, %v383_v8  ;;  %v400_v35 = vmul.f32 %v1851_v20, %v381_v36  ;;  %v341_v60 = vmul.f32 %v1845_v18, %v334_v51  ;;  %v342_v42 = vmul.f32 %v1845_v18, %v335_v41 }
 0x11d   : >> { %v352_v36 = vmul.f32 %v1856_v22, %v334_v51  ;;  %v353_v8 = vmul.f32 %v1856_v22, %v335_v41  ;;  %v363_v0 = vmul.f32 %v1859_v23, %v334_v51  ;;  %v397_v61 = vmul.f32 %v1848_v19, %v382_v11 }
 0x11e   : >> { %v437_v4 = vpop.permute.xlu1 %436  ;;  %v435_v24 = vpop.permute.xlu0 %434  ;;  %v398_v14 = vmul.f32 %v1851_v20, %v380_v5  ;;  %v406_v17 = vmul.f32 %v1871_v28, %v399_v7  ;;  %v407_v16 = vmul.f32 %v1871_v28, %v400_v35  ;;  %v365_v51 = vmul.f32 %v1859_v23, %v336_v6 }
 0x11f   : >> { %v417_v41 = vmul.f32 %v1874_v29, %v399_v7  ;;  %v366_v5 = vmul.f32 %v1859_v23, %v337_v1  ;;  %v418_v19 = vmul.f32 %v1874_v29, %v400_v35  ;;  %v428_v18 = vmul.f32 %v1877_v30, %v399_v7 }
 0x120   : >> { %v429_v20 = vmul.f32 %v1877_v30, %v400_v35  ;;  %v404_v12 = vmul.f32 %v1871_v28, %v397_v61  ;;  %v405_v22 = vmul.f32 %v1871_v28, %v398_v14  ;;  %v410_v3 = vadd.f32 %v406_v17, %v343_v27 }
 0x121   : >> { %v411_v1 = vadd.f32 %v407_v16, %v344_v15  ;;  %v421_v7 = vadd.f32 %v417_v41, %v354_v21  ;;  %v415_v2 = vmul.f32 %v1874_v29, %v397_v61  ;;  %v422_v58 = vadd.f32 %v418_v19, %v355_v34 }
 0x122   : >> { %v441_v11 = vpop.permute.xlu1 %440  ;;  %v439_v31 = vpop.permute.xlu0 %438  ;;  %v416_v57 = vmul.f32 %v1874_v29, %v398_v14  ;;  %v427_v16 = vmul.f32 %v1877_v30, %v398_v14  ;;  %v433_v41 = vadd.f32 %v429_v20, %v366_v5  ;;  %v409_v34 = vadd.f32 %v405_v22, %v342_v42 }
 0x123   : >> { %v444_v6 = vsel %vm442_vm4, %v437_v4, %v441_v11  ;;  %v446_v9 = vsel %vm442_vm4, %v441_v11, %v437_v4  ;;  %v443_v23 = vsel %vm442_vm4, %v435_v24, %v439_v31  ;;  %v445_v35 = vsel %vm442_vm4, %v439_v31, %v435_v24 }
 0x124   : >> { %v462_v59 = vmul.f32 %v1862_v25, %v446_v9  ;;  %v463_v28 = vmul.f32 %v1865_v26, %v444_v6  ;;  %v426_v4 = vmul.f32 %v1877_v30, %v397_v61  ;;  %v460_v21 = vmul.f32 %v1862_v25, %v445_v35 }
 0x125   : >> { %v461_v24 = vmul.f32 %v1865_v26, %v443_v23  ;;  %v432_v9 = vadd.f32 %v428_v18, %v365_v51  ;;  %v408_v11 = vadd.f32 %v404_v12, %v341_v60  ;;  %v419_v19 = vadd.f32 %v415_v2, %v352_v36 }
 0x126   : >> { %v500_v17 = vpop.permute.xlu1 %499  ;;  %v498_v15 = vpop.permute.xlu0 %497  ;;  %v469_v27 = vmul.f32 %v1886_v32, %v462_v59  ;;  %v470_v31 = vmul.f32 %v1886_v32, %v463_v28  ;;  %v480_v29 = vmul.f32 %v1889_v33, %v462_v59  ;;  %v481_v61 = vmul.f32 %v1889_v33, %v463_v28 }
 0x127   : >> { %v491_v30 = vmul.f32 %v1898_v37, %v462_v59  ;;  %v420_v14 = vadd.f32 %v416_v57, %v353_v8  ;;  %v430_v6 = vadd.f32 %v426_v4, %v363_v0  ;;  %v431_v56 = vadd.f32 %v427_v16, %v364_v13 }
 0x128   : >> { %v492_v63 = vmul.f32 %v1898_v37, %v463_v28  ;;  %v473_v35 = vadd.f32 %v469_v27, %v410_v3  ;;  %v474_v26 = vadd.f32 %v470_v31, %v411_v1  ;;  %v467_v51 = vmul.f32 %v1886_v32, %v460_v21 }
 0x129   : >> { %v468_v12 = vmul.f32 %v1886_v32, %v461_v24  ;;  %v484_v3 = vadd.f32 %v480_v29, %v421_v7  ;;  %v485_v42 = vadd.f32 %v481_v61, %v422_v58  ;;  %v495_v36 = vadd.f32 %v491_v30, %v432_v9 }
 0x12a   : >> { %v504_v55 = vpop.permute.xlu1 %503  ;;  %v502_v25 = vpop.permute.xlu0 %501  ;;  %v478_v8 = vmul.f32 %v1889_v33, %v460_v21  ;;  %v496_v20 = vadd.f32 %v492_v63, %v433_v41  ;;  %v479_v22 = vmul.f32 %v1889_v33, %v461_v24  ;;  %v489_v1 = vmul.f32 %v1898_v37, %v460_v21 }
 0x12b   : >> { %v507_v2 = vsel %vm505_vm5, %v500_v17, %v504_v55  ;;  %v509_v60 = vsel %vm505_vm5, %v504_v55, %v500_v17  ;;  %v506_v57 = vsel %vm505_vm5, %v498_v15, %v502_v25  ;;  %v508_v59 = vsel %vm505_vm5, %v502_v25, %v498_v15 }
 0x12c   : >> { %v525_v32 = vmul.f32 %v1901_v38, %v509_v60  ;;  %v526_v0 = vmul.f32 %v1904_v39, %v507_v2  ;;  %v523_v13 = vmul.f32 %v1901_v38, %v508_v59  ;;  %v524_v55 = vmul.f32 %v1904_v39, %v506_v57 }
 0x12d   : >> { %v490_v58 = vmul.f32 %v1898_v37, %v461_v24  ;;  %v471_v23 = vadd.f32 %v467_v51, %v408_v11  ;;  %v472_v7 = vadd.f32 %v468_v12, %v409_v34  ;;  %v482_v17 = vadd.f32 %v478_v8, %v419_v19 }
 0x12e   : >> { %v596_v5 = vpop.permute.xlu1 %595  ;;  %v594_v18 = vpop.permute.xlu0 %593  ;;  %v532_v28 = vmul.f32 %v1907_v40, %v525_v32  ;;  %v533_v4 = vmul.f32 %v1907_v40, %v526_v0  ;;  %v543_v16 = vmul.f32 %v1913_v43, %v525_v32  ;;  %v544_v38 = vmul.f32 %v1913_v43, %v526_v0 }
 0x12f   : >> { %v554_v39 = vmul.f32 %v1916_v44, %v525_v32  ;;  %v555_v63 = vmul.f32 %v1916_v44, %v526_v0  ;;  %v530_v15 = vmul.f32 %v1907_v40, %v523_v13  ;;  %v531_v37 = vmul.f32 %v1907_v40, %v524_v55 }
 0x130   : >> { %v536_v33 = vadd.f32 %v532_v28, %v473_v35  ;;  %v483_v21 = vadd.f32 %v479_v22, %v420_v14  ;;  %v493_v24 = vadd.f32 %v489_v1, %v430_v6  ;;  %v494_v9 = vadd.f32 %v490_v58, %v431_v56  ;;  %v2417_v22 = vld [vmem:[#allocation34_spill] sm:$0xff]  ;;  %v2420_v28 = vld [vmem:[#allocation32_spill] sm:$0xff] }
 0x131   : >> { %v537_v41 = vadd.f32 %v533_v4, %v474_v26  ;;  %v541_v11 = vmul.f32 %v1913_v43, %v523_v13  ;;  %v542_v34 = vmul.f32 %v1913_v43, %v524_v55  ;;  %v552_v29 = vmul.f32 %v1916_v44, %v523_v13  ;;  %v2416_v13 = vld [vmem:[#allocation29_spill] sm:$0xff] }
 0x132   : >> { %v600_v27 = vpop.permute.xlu1 %599  ;;  %v598_v31 = vpop.permute.xlu0 %597  ;;  %v553_v19 = vmul.f32 %v1916_v44, %v524_v55  ;;  %v547_v61 = vadd.f32 %v543_v16, %v484_v3  ;;  %v548_v30 = vadd.f32 %v544_v38, %v485_v42  ;;  %v558_v25 = vadd.f32 %v554_v39, %v495_v36  ;;  %v2421_v4 = vld [vmem:[#allocation33_spill] sm:$0xff]  ;;  %v2422_v38 = vld [vmem:[#allocation35_spill] sm:$0xff] }
 0x133   : >> { %v559_v40 = vadd.f32 %v555_v63, %v496_v20  ;;  %v534_v35 = vadd.f32 %v530_v15, %v471_v23  ;;  %v535_v51 = vadd.f32 %v531_v37, %v472_v7  ;;  %v546_v14 = vadd.f32 %v542_v34, %v483_v21  ;;  %v2419_v23 = vld [vmem:[#allocation31_spill] sm:$0xff]  ;;  %v2423_v34 = vld [vmem:[#allocation36_spill] sm:$0xff] }
 0x134   : >> { %v569_v56 = vadd.f32 %v1919_v45, %v536_v33  ;;  %v545_v12 = vadd.f32 %v541_v11, %v482_v17  ;;  %v570_v2 = vadd.f32 %v1922_v46, %v537_v41  ;;  %v603_v43 = vsel %vm601_vm6, %v596_v5, %v600_v27 }
 0x135   : >> { %v605_v44 = vsel %vm601_vm6, %v600_v27, %v596_v5  ;;  %v556_v60 = vadd.f32 %v552_v29, %v493_v24  ;;  %v557_v57 = vadd.f32 %v553_v19, %v494_v9  ;;  %v621_v59 = vmul.f32 %v1936_v50, %v603_v43  ;;  %v2424_v29 = vld [vmem:[#allocation37_spill] sm:$0xff] }
 0x136   : >> { %v659_v6 = vpop.permute.xlu1 %658  ;;  %v657_v26 = vpop.permute.xlu0 %656  ;;  %v622_v3 = vmul.f32 %v1942_v53, %v605_v44  ;;  %v580_v42 = vadd.f32 %v1927_v47, %v547_v61  ;;  %v581_v45 = vadd.f32 %v1930_v48, %v548_v30  ;;  %v591_v36 = vadd.f32 %v1933_v49, %v558_v25  ;;  %v2426_v44 = vld [vmem:[#allocation39_spill] sm:$0xff] }
 0x137   : >> { %v592_v46 = vadd.f32 %v1939_v52, %v559_v40  ;;  %v628_v8 = vmul.f32 %v1969_v62, %v621_v59  ;;  %v568_v0 = vadd.f32 %v1945_v54, %v535_v51  ;;  %v579_v55 = vadd.f32 %v2416_v13, %v546_v14  ;;  %v2418_v52 = vld [vmem:[#allocation30_spill] sm:$0xff] }
 0x138   : >> { %v629_v32 = vmul.f32 %v1969_v62, %v622_v3  ;;  %v639_v1 = vmul.f32 %v2417_v22, %v621_v59  ;;  %v640_v47 = vmul.f32 %v2417_v22, %v622_v3  ;;  %v602_v48 = vsel %vm601_vm6, %v594_v18, %v598_v31  ;;  %v2425_v14 = vld [vmem:[#allocation38_spill] sm:$0xff] }
 0x139   : >> { %v604_v49 = vsel %vm601_vm6, %v598_v31, %v594_v18  ;;  %v590_v58 = vadd.f32 %v2418_v52, %v557_v57  ;;  %v567_v7 = vadd.f32 %v2419_v23, %v534_v35  ;;  %v578_v54 = vadd.f32 %v2420_v28, %v545_v12 }
 0x13a   : >> { %v663_v5 = vpop.permute.xlu1 %662  ;;  %v661_v20 = vpop.permute.xlu0 %660  ;;  %v589_v16 = vadd.f32 %v2421_v4, %v556_v60  ;;  %v650_v39 = vmul.f32 %v2422_v38, %v621_v59  ;;  %v651_v63 = vmul.f32 %v2422_v38, %v622_v3  ;;  %v619_v17 = vmul.f32 %v1936_v50, %v602_v48  ;;  %v2427_v59 = vld [vmem:[#allocation40_spill] sm:$0xff]  ;;  %v2428_v4 = vld [vmem:[#allocation41_spill] sm:$0xff] }
 0x13b   : >> { %v620_v33 = vmul.f32 %v1942_v53, %v604_v49  ;;  %v632_v15 = vadd.f32 %v628_v8, %v569_v56  ;;  %v633_v18 = vadd.f32 %v629_v32, %v570_v2  ;;  %v666_v37 = vsel %vm664_vm7, %v659_v6, %v663_v5 }
 0x13c   : >> { %v668_v27 = vsel %vm664_vm7, %v663_v5, %v659_v6  ;;  %v643_v24 = vadd.f32 %v639_v1, %v580_v42  ;;  %v644_v9 = vadd.f32 %v640_v47, %v581_v45  ;;  %v626_v41 = vmul.f32 %v1969_v62, %v619_v17 }
 0x13d   : >> { %v627_v11 = vmul.f32 %v1969_v62, %v620_v33  ;;  %v684_v50 = vmul.f32 %v2423_v34, %v666_v37  ;;  %v685_v53 = vmul.f32 %v2424_v29, %v668_v27  ;;  %v665_v19 = vsel %vm664_vm7, %v657_v26, %v661_v20  ;;  %v2430_v37 = vld [vmem:[#allocation43_spill] sm:$0xff] }
 0x13e   : >> { %v722_v31 = vpop.permute.xlu1 %721  ;;  %v720_v21 = vpop.permute.xlu0 %719  ;;  %v667_v61 = vsel %vm664_vm7, %v661_v20, %v657_v26  ;;  %v637_v30 = vmul.f32 %v2417_v22, %v619_v17  ;;  %v638_v25 = vmul.f32 %v2417_v22, %v620_v33  ;;  %v648_v40 = vmul.f32 %v2422_v38, %v619_v17 }
 0x13f   : >> { %v649_v35 = vmul.f32 %v2422_v38, %v620_v33  ;;  %v654_v51 = vadd.f32 %v650_v39, %v591_v36  ;;  %v655_v62 = vadd.f32 %v651_v63, %v592_v46  ;;  %v691_v56 = vmul.f32 %v2425_v14, %v684_v50  ;;  %v2429_v38 = vld [vmem:[#allocation42_spill] sm:$0xff] }
 0x140   : >> { %v692_v6 = vmul.f32 %v2425_v14, %v685_v53  ;;  %v630_v2 = vadd.f32 %v626_v41, %v567_v7  ;;  %v631_v43 = vadd.f32 %v627_v11, %v568_v0  ;;  %v702_v60 = vmul.f32 %v2426_v44, %v684_v50  ;;  %v2432_v11 = vld [vmem:[#allocation45_spill] sm:$0xff] }
 0x141   : >> { %v703_v26 = vmul.f32 %v2426_v44, %v685_v53  ;;  %v713_v3 = vmul.f32 %v2427_v59, %v684_v50  ;;  %v714_v42 = vmul.f32 %v2427_v59, %v685_v53  ;;  %v682_v45 = vmul.f32 %v2423_v34, %v665_v19 }
 0x142   : >> { %v726_v12 = vpop.permute.xlu1 %725  ;;  %v724_v57 = vpop.permute.xlu0 %723  ;;  %v683_v36 = vmul.f32 %v2424_v29, %v667_v61  ;;  %v641_v46 = vadd.f32 %v637_v30, %v578_v54  ;;  %v642_v8 = vadd.f32 %v638_v25, %v579_v55  ;;  %v652_v32 = vadd.f32 %v648_v40, %v589_v16 }
 0x143   : >> { %v653_v13 = vadd.f32 %v649_v35, %v590_v58  ;;  %v695_v0 = vadd.f32 %v691_v56, %v632_v15  ;;  %v696_v5 = vadd.f32 %v692_v6, %v633_v18  ;;  %v689_v20 = vmul.f32 %v2425_v14, %v682_v45 }
 0x144   : >> { %v690_v22 = vmul.f32 %v2425_v14, %v683_v36  ;;  %v706_v1 = vadd.f32 %v702_v60, %v643_v24  ;;  %v707_v47 = vadd.f32 %v703_v26, %v644_v9  ;;  %v729_v48 = vsel %vm727_vm8, %v722_v31, %v726_v12  ;;  %v2431_v24 = vld [vmem:[#allocation44_spill] sm:$0xff] }
 0x145   : >> { %v731_v49 = vsel %vm727_vm8, %v726_v12, %v722_v31  ;;  %v717_v55 = vadd.f32 %v713_v3, %v654_v51  ;;  %v718_v23 = vadd.f32 %v714_v42, %v655_v62  ;;  %v700_v58 = vmul.f32 %v2426_v44, %v682_v45 }
 0x146   : >> { %v785_v52 = vpop.permute.xlu1 %784  ;;  %v701_v7 = vmul.f32 %v2426_v44, %v683_v36  ;;  %v711_v28 = vmul.f32 %v2427_v59, %v682_v45  ;;  %v712_v54 = vmul.f32 %v2427_v59, %v683_v36  ;;  %v747_v16 = vmul.f32 %v2428_v4, %v729_v48  ;;  %v783_v63 = vpop.permute.xlu0 %782  ;;  %v2433_v45 = vld [vmem:[#allocation26_spill] sm:$0xff] }
 0x147   : >> { %v748_v39 = vmul.f32 %v2429_v38, %v731_v49  ;;  %v693_v17 = vadd.f32 %v689_v20, %v630_v2  ;;  %v694_v33 = vadd.f32 %v690_v22, %v631_v43  ;;  %v728_v15 = vsel %vm727_vm8, %v720_v21, %v724_v57  ;;  %v2434_v36 = vld [vmem:[#allocation46_spill] sm:$0xff] }
 0x148   : >> { %v730_v18 = vsel %vm727_vm8, %v724_v57, %v720_v21  ;;  %v754_v27 = vmul.f32 %v2430_v37, %v747_v16  ;;  %v765_v9 = vmul.f32 %v2431_v24, %v747_v16  ;;  %v776_v34 = vmul.f32 %v2432_v11, %v747_v16 }
 0x149   : >> { %v755_v31 = vmul.f32 %v2430_v37, %v748_v39  ;;  %v766_v41 = vmul.f32 %v2431_v24, %v748_v39  ;;  %v777_v50 = vmul.f32 %v2432_v11, %v748_v39  ;;  %v745_v29 = vmul.f32 %v2428_v4, %v728_v15 }
 0x14a   : >> { %v746_v53 = vmul.f32 %v2429_v38, %v730_v18  ;;  %v704_v19 = vadd.f32 %v700_v58, %v641_v46  ;;  %v705_v61 = vadd.f32 %v701_v7, %v642_v8  ;;  %v715_v30 = vadd.f32 %v711_v28, %v652_v32  ;;  %v789_v25 = vpop.permute.xlu1 %788  ;;  %v787_v2 = vpop.permute.xlu0 %786  ;;  %v2435_v8 = vld [vmem:[#allocation47_spill] sm:$0xff]  ;;  %v2438_v58 = vld [vmem:[#allocation50_spill] sm:$0xff] }
 0x14b   : >> { %v716_v21 = vadd.f32 %v712_v54, %v653_v13  ;;  %v758_v40 = vadd.f32 %v754_v27, %v695_v0  ;;  %v759_v35 = vadd.f32 %v755_v31, %v696_v5  ;;  %v752_v51 = vmul.f32 %v2430_v37, %v745_v29 }
 0x14c   : >> { %v753_v62 = vmul.f32 %v2430_v37, %v746_v53  ;;  %v769_v14 = vadd.f32 %v765_v9, %v706_v1  ;;  %v770_v56 = vadd.f32 %v766_v41, %v707_v47  ;;  %v763_v6 = vmul.f32 %v2431_v24, %v745_v29  ;;  %v2436_v47 = vld [vmem:[#allocation48_spill] sm:$0xff] }
 0x14d   : >> { %v764_v12 = vmul.f32 %v2431_v24, %v746_v53  ;;  %v780_v43 = vadd.f32 %v776_v34, %v717_v55  ;;  %v781_v44 = vadd.f32 %v777_v50, %v718_v23  ;;  %v792_v60 = vsel %vm790_vm9, %v785_v52, %v789_v25 }
 0x14e   : >> { %v794_v26 = vsel %vm790_vm9, %v789_v25, %v785_v52  ;;  %v756_v57 = vadd.f32 %v752_v51, %v693_v17  ;;  %v757_v59 = vadd.f32 %v753_v62, %v694_v33  ;;  %v774_v3 = vmul.f32 %v2432_v11, %v745_v29  ;;  %v2437_v52 = vld [vmem:[#allocation49_spill] sm:$0xff]  ;;  %v2439_v62 = vld [vmem:[#allocation27_spill] sm:$0xff] }
 0x14f   : >> { %v775_v42 = vmul.f32 %v2432_v11, %v746_v53  ;;  %vm849_vm10 = vcmp.lt.s32.totalorder %v2433_v45, 1  ;;  %v810_v46 = vmul.f32 %v2434_v36, %v792_v60  ;;  %v811_v32 = vmul.f32 %v2435_v8, %v794_v26 }
 0x150   : >> { %v791_v13 = vsel %vm790_vm9, %v783_v63, %v787_v2  ;;  %v793_v0 = vsel %vm790_vm9, %v787_v2, %v783_v63  ;;  %v767_v5 = vadd.f32 %v763_v6, %v704_v19  ;;  %v768_v20 = vadd.f32 %v764_v12, %v705_v61 }
 0x151   : >> { %v808_v22 = vmul.f32 %v2434_v36, %v791_v13  ;;  %v809_v1 = vmul.f32 %v2435_v8, %v793_v0  ;;  %v817_v48 = vmul.f32 %v2436_v47, %v810_v46  ;;  %v818_v49 = vmul.f32 %v2436_v47, %v811_v32 }
 0x152   : >> { %v828_v55 = vmul.f32 %v2437_v52, %v810_v46  ;;  %v829_v23 = vmul.f32 %v2437_v52, %v811_v32  ;;  %vm866_vm11 = vcmp.lt.s32.totalorder %v2433_v45, 7  ;;  %v839_v7 = vmul.f32 %v2438_v58, %v810_v46 }
 0x153   : >> { %v840_v10 = vmul.f32 %v2438_v58, %v811_v32  ;;  %v815_v28 = vmul.f32 %v2436_v47, %v808_v22  ;;  %v816_v54 = vmul.f32 %v2436_v47, %v809_v1  ;;  %v778_v4 = vadd.f32 %v774_v3, %v715_v30 }
 0x154   : >> { %v779_v16 = vadd.f32 %v775_v42, %v716_v21  ;;  %v821_v38 = vadd.f32 %v817_v48, %v758_v40  ;;  %v822_v39 = vadd.f32 %v818_v49, %v759_v35  ;;  %v843_v63 = vadd.f32 %v839_v7, %v780_v43  ;;  %v2440_v42 = vld [vmem:[#allocation28_spill] sm:$0xff] }
 0x155   : >> { %v844_v17 = vadd.f32 %v840_v10, %v781_v44  ;;  %v819_v33 = vadd.f32 %v815_v28, %v756_v57  ;;  %v820_v15 = vadd.f32 %v816_v54, %v757_v59  ;;  %v826_v27 = vmul.f32 %v2437_v52, %v808_v22 }
 0x156   : >> { %v847_v18 = vrot.slane %v821_v38, 7  ;;  %v848_v37 = vrot.slane %v822_v39, 7  ;;  %v827_v31 = vmul.f32 %v2437_v52, %v809_v1  ;;  %v832_v24 = vadd.f32 %v828_v55, %v769_v14 }
 0x157   : >> { %v833_v9 = vadd.f32 %v829_v23, %v770_v56  ;;  %v837_v41 = vmul.f32 %v2438_v58, %v808_v22  ;;  %v838_v11 = vmul.f32 %v2438_v58, %v809_v1  ;;  %v864_v34 = vrot.slane %v843_v63, 1 }
 0x158   : >> { %v865_v50 = vrot.slane %v844_v17, 1  ;;  %v845_v29 = vrot.slane %v819_v33, 7  ;;  %v846_v53 = vrot.slane %v820_v15, 7  ;;  %v830_v19 = vadd.f32 %v826_v27, %v767_v5 }
 0x159   : >> { %v831_v61 = vadd.f32 %v827_v31, %v768_v20  ;;  %v841_v30 = vadd.f32 %v837_v41, %v778_v4  ;;  %v842_v21 = vadd.f32 %v838_v11, %v779_v16  ;;  %v880_v13 = vstv %s879_s26 }
 0x15a   : >> { %v852_v25 = vsel %vm849_vm10, %v847_v18, %v845_v29  ;;  %v853_v40 = vsel %vm849_vm10, %v848_v37, %v846_v53  ;;  %v850_v35 = vsel %vm849_vm10, %v845_v29, %v847_v18  ;;  %v851_v51 = vsel %vm849_vm10, %v846_v53, %v848_v37 }
 0x15b   : >> { %v854_v14 = vmul.f32 %v2439_v62, %v852_v25  ;;  %v855_v56 = vmul.f32 %v2439_v62, %v853_v40  ;;  %v862_v6 = vrot.slane %v841_v30, 1  ;;  %v863_v12 = vrot.slane %v842_v21, 1 }
 0x15c   : >> { %v860_v2 = vadd.f32 %v850_v35, %v832_v24  ;;  %v861_v43 = vadd.f32 %v851_v51, %v833_v9  ;;  %v945_v35 = vstv %s940_s14 }
 0x15d   : >> { %v858_v44 = vadd.f32 %v854_v14, %v830_v19  ;;  %v859_v60 = vadd.f32 %v855_v56, %v831_v61  ;;  %v867_v26 = vsel %vm866_vm11, %v862_v6, %v864_v34  ;;  %v868_v57 = vsel %vm866_vm11, %v863_v12, %v865_v50 }
 0x15e   : >> { %v869_v59 = vsel %vm866_vm11, %v864_v34, %v862_v6  ;;  %v870_v3 = vsel %vm866_vm11, %v865_v50, %v863_v12  ;;  %v934_v61 = vstv %s933_s7 }
 0x15f   : >> { %v873_v36 = vmul.f32 %v2440_v42, %v869_v59  ;;  %v874_v46 = vmul.f32 %v2440_v42, %v870_v3  ;;  %v875_v8 = vadd.f32 %v867_v26, %v858_v44  ;;  %v876_v32 = vadd.f32 %v868_v57, %v859_v60 }
 0x161   : >> { %v877_v0 = vadd.f32 %v873_v36, %v860_v2  ;;  %v878_v5 = vadd.f32 %v874_v46, %v861_v43  ;;  %v881_v20 = vadd.f32 %v880_v13, %v875_v8  ;;  %v882_v22 = vadd.f32 %v880_v13, %v876_v32 }
 0x163   : >> { %v883_v1 = vadd.f32 %v880_v13, %v877_v0  ;;  %v885_v47 = vadd.f32 %v882_v22, %v881_v20  ;;  %v884_v48 = vadd.f32 %v880_v13, %v878_v5 }
 0x165   : >> { %v886_v49 = vadd.f32 %v885_v47, %v883_v1 }
 0x167   : >> { %v887_v52 = vadd.f32 %v886_v49, %v884_v48 }
 0x169   : >> { %888 = vadd.xlane.f32.xlu0 %v887_v52 }
 0x1f6   : >> { %v889_v55 = vpop.xlane.xlu0 %888 }
 0x1f7   : >> { %v890_v45 = vrot.slane %v889_v55, 4 }
 0x1f9   : >> { %v891_v23 = vadd.f32 %v890_v45, %v889_v55 }
 0x1fb   : >> { %v892_v58 = vrot.slane %v891_v23, 2 }
 0x1fd   : >> { %v893_v7 = vadd.f32 %v892_v58, %v891_v23 }
 0x1ff   : >> { %v894_v10 = vrot.slane %v893_v7, 1 }
 0x201   : >> { %v895_v28 = vadd.f32 %v894_v10, %v893_v7 }
 0x203   : >> { %1139 = vpush %v895_v28 }
 0x234   : >> { %s1140_s22 = spop %1139 }
 0x235   : >> { %s897_s5 = smul.f32 0.00024414063, %s1140_s22 }
 0x237   : >> { %v898_v54 = vstv %s897_s5 }
 0x238   : >> { %v899_v4 = vsub.f32 %v881_v20, %v898_v54  ;;  %v900_v16 = vsub.f32 %v882_v22, %v898_v54  ;;  %v901_v38 = vsub.f32 %v883_v1, %v898_v54  ;;  %v902_v39 = vsub.f32 %v884_v48, %v898_v54 }
 0x23a   : >> { %v903_v63 = vmul.f32 %v899_v4, %v899_v4  ;;  %v904_v17 = vmul.f32 %v900_v16, %v900_v16  ;;  %v905_v33 = vmul.f32 %v901_v38, %v901_v38  ;;  %v906_v18 = vmul.f32 %v902_v39, %v902_v39 }
 0x23c   : >> { %v907_v15 = vadd.f32 %v904_v17, %v903_v63 }
 0x23e   : >> { %v908_v37 = vadd.f32 %v907_v15, %v905_v33 }
 0x240   : >> { %v909_v27 = vadd.f32 %v908_v37, %v906_v18 }
 0x242   : >> { %910 = vadd.xlane.f32.xlu1 %v909_v27 }
 0x2cf   : >> { %v911_v31 = vpop.xlane.xlu1 %910 }
 0x2d0   : >> { %v912_v24 = vrot.slane %v911_v31, 4 }
 0x2d2   : >> { %v913_v9 = vadd.f32 %v912_v24, %v911_v31 }
 0x2d4   : >> { %v914_v41 = vrot.slane %v913_v9, 2 }
 0x2d6   : >> { %v915_v11 = vadd.f32 %v914_v41, %v913_v9 }
 0x2d8   : >> { %v916_v34 = vrot.slane %v915_v11, 1 }
 0x2da   : >> { %v917_v50 = vadd.f32 %v916_v34, %v915_v11 }
 0x2dc   : >> { %1141 = vpush %v917_v50 }
 0x30d   : >> { %s1142_s0 = spop %1141 }
 0x30e   : >> { %s919_s8 = smul.f32 0.00024414063, %s1142_s0 }
 0x310   : >> { %s920_s29 = sadd.f32 1e-05, %s919_s8 }
 0x312   : >> { %v921_v29 = vstv %s920_s29 }
 0x313   : >> { %1259 = vrsqrt.f32 %v921_v29 }
 0x31d   : >> { %v1260_v53 = vpop.eup %1259 }
 0x31e   : >> { %1143 = vpush %v1260_v53 }
 0x34f   : >> { %s1144_s6 = spop %1143 }
 0x350   : >> { %s926_s25 = smul.f32 %s1144_s6, %s925_s12 }
 0x352   : >> { %v927_v19 = vstv %s926_s25 }
 0x353   : >> { %v928_v30 = vmul.f32 %v927_v19, %v899_v4  ;;  %v929_v21 = vmul.f32 %v927_v19, %v900_v16  ;;  %v930_v25 = vmul.f32 %v927_v19, %v901_v38  ;;  %v931_v40 = vmul.f32 %v927_v19, %v902_v39 }
 0x355   : >> { %v935_v51 = vadd.f32 %v934_v61, %v928_v30  ;;  %v936_v14 = vadd.f32 %v934_v61, %v929_v21  ;;  %v937_v56 = vadd.f32 %v934_v61, %v930_v25  ;;  %v938_v6 = vadd.f32 %v934_v61, %v931_v40 }
 0x356   : > { %296 = sbr.rel (!%p294_p4) target bundleno = 148 (0x94), region = 112 }
 0x357   : >> { %vm941_vm12 = vcmp.ge.f32.partialorder %v935_v51, 0.0  ;;  %vm942_vm13 = vcmp.ge.f32.partialorder %v936_v14, 0.0  ;;  %vm943_vm14 = vcmp.ge.f32.partialorder %v937_v56, 0.0  ;;  %vm944_vm15 = vcmp.ge.f32.partialorder %v938_v6, 0.0 }
 0x358   : >> { %v946_v12 = vmul.f32 %v945_v35, %v935_v51  ;;  %v947_v2 = vmul.f32 %v945_v35, %v936_v14  ;;  %v948_v43 = vmul.f32 %v945_v35, %v937_v56  ;;  %v949_v44 = vmul.f32 %v945_v35, %v938_v6 }
 0x35a   : >> { %v950_v60 = vsel %vm941_vm12, %v935_v51, %v946_v12  ;;  %v951_v26 = vsel %vm942_vm13, %v936_v14, %v947_v2  ;;  %v952_v57 = vsel %vm943_vm14, %v937_v56, %v948_v43  ;;  %v953_v59 = vsel %vm944_vm15, %v938_v6, %v949_v44 }
 0x35b   : >> { %956 = vst [vmem:[%s955_s30] sm:$0xff] %v950_v60  ;;  %957 = vst [vmem:[%s955_s30 + $0x8] sm:$0xff] %v951_v26 }
 0x35c   : >> { %958 = vst [vmem:[%s955_s30 + $0x10] sm:$0xff] %v952_v57  ;;  %959 = vst [vmem:[%s955_s30 + $0x18] sm:$0xff] %v953_v59 }
 0x35d   : > { %1360 = shalt.err (!%p1357_p0)
}
 0x35e   : > { %s1361_s23 = scalar_lea.hbm %s2268_s15, 4096  ;;  %s1365_s22 = scalar_lea.hbm %s2324_s4, 8192 }
 0x35f   : > { %p1362_p5 = scmp.ne.s32.totalorder %s2268_s15, %s1361_s23  ;;  %p1366_p12 = scmp.lt.u32.totalorder %s2268_s15, %s2324_s4 }
 0x360   : > { %p1367_p8 = scmp.lt.u32.totalorder %s1365_s22, %s1361_s23  ;;  %p1369_p2 = scmp.lt.u32.totalorder %s1361_s23, %s2268_s15 }
 0x361   : > { %p1363_p13 = pnand %p1362_p5, %p2442_p3 }
 0x362   : > { %p1368_p4 = por %p1367_p8, %p1366_p12 }
 0x363   : > { %p1364_p7 = pneg %p1363_p13 }
 0x364   : > { %p1370_p1 = por %p1369_p2, %p1368_p4 }
 0x366   : > { %p1371_p6 = pnand %p1370_p1, %p1364_p7 }
 0x368   : > { %1374 = shalt.err (!%p1371_p6)
}
 0x369   : > { %s1467_s8 = smov 256   ;;  %s1468_s29 = smov 16  }
 0x36a   : > { %1159 = dma.vmem_to_hbm [thread:$0]  (%p2442_p3), %s2271_s20, 4096, %s2268_s15, %s961_s24, %s1467_s8, %s1467_s8, %s1468_s29  }
 0x36b PF: > { %s2443_s10 = sld [smem:[#allocation17_spill]]  ;;  %s2444_s16 = sld [smem:[#allocation22_spill]] }
 0x36c   : > { %s2445_s12 = sld [smem:[#allocation21_spill]] }
 0x371   : > { %s992_s17 = sand.u32 1, %s2443_s10   ;;  %p2446_p9 = scmp.ne.s32.totalorder %s2444_s16, 0 }
 0x372   : > { %p2447_p10 = scmp.ge.s32.totalorder %s2445_s12, 2  ;;  %s993_s7 = scalar_lea.sflag [#allocation4], %s992_s17 }
 0x374   : > { %p1176_p11 = pnand %p2447_p10, %p2446_p9 }
 0x376   : > { %1420 = dma.done.wait (!%p1176_p11), %s993_s7, 4096  }
 0x377   : > { %1422 = vsyncadd (!%p1176_p11), %s993_s7, 4294963200  ;;  %s23_s20 = sadd.s32 1, %s2445_s12   ;;  %s2448_s15 = sld [smem:[#allocation18_spill]] }
 0x378   : > { %p20_p0 = scmp.ge.s32.totalorder %s23_s20, 4   ;;  %s2449_s16 = sld [smem:[#allocation19_spill]] }
 0x379   : > { %s2450_s17 = sld [smem:[#allocation24_spill]]  ;;  %s2451_s18 = sld [smem:[#allocation20_spill]] }
 0x37a   : > { %s2452_s19 = sld [smem:[#allocation23_spill]]  ;;  %22 = sbr.rel (!%p20_p0) target bundleno = 14 (0xe), region = 123 }
 0x381   :  { %998 = vsyncpa [#allocation3], 1 }
 0x382   :  { %1000 = vsyncpa [#allocation3 + $0x1], 1 }
 0x383   :  { %1001 = vsyncpa [#allocation10], 1 }
 0x384   :  { %1003 = vsyncpa [#allocation10 + $0x1], 1 }
 0x385   :  { %1004 = vsyncpa [#allocation4], 1 }
 0x386   :  { %1006 = vsyncpa [#allocation4 + $0x1], 1 }
 0x387   :  { %1007 = vsyncpa [#allocation5], 1 }
 0x388   :  { %1009 = vsyncpa [#allocation5 + $0x1], 1 }
 0x389   :  { %1010 = vsyncpa [#allocation6], 1 }
 0x38a   :  { %1012 = vsyncpa [#allocation6 + $0x1], 1 }

</bundles_post_ra>
